<compile_context>
chip_gen: v5e
topology: v5e:2x2
jax: 0.10.0
libtpu: 0.0.40
codegen_flags: <defaults>
</compile_context>

<pallas_src>
import jax
import jax.numpy as jnp
from jax.experimental import pallas as pl
from jax.experimental.pallas import tpu as pltpu

LN_EPS = 1e-5
NEG_SLOPE = 0.1      # matches F.leaky_relu(..., 0.1) in the PyTorch module
K_IN = 42            # true fc1 fan-in
K_PAD = 128          # fc1 contraction dim zero-padded to a lane multiple
TB = 256             # max batch tile: fills the 256-row MXU on v6e/v7x (>=128 for v5e)


def _leaky_relu(x):
    return jnp.where(x >= 0, x, NEG_SLOPE * x)


def _layer_norm(x, gamma, beta):
    # PyTorch LayerNorm: biased variance over the last dim, eps=1e-5.
    mean = jnp.mean(x, axis=-1, keepdims=True)
    var = jnp.mean(jnp.square(x - mean), axis=-1, keepdims=True)
    inv = jax.lax.rsqrt(var + LN_EPS)
    return (x - mean) * inv * gamma + beta


def discriminator_kernel(
    x_ref,
    w1_ref, b1_ref, g1_ref, be1_ref,
    w2_ref, b2_ref, g2_ref, be2_ref,
    w3_ref, b3_ref, g3_ref, be3_ref,
    w4_ref, b4_ref,
    out_ref,
):
    # bf16 operands into the MXU, f32 accumulation; elementwise math in f32.
    x = x_ref[...]                                                  # (tb, 128) bf16

    # fc1 -> layernorm1 -> leaky_relu   (dropout == identity, eval semantics)
    h = jnp.dot(x, w1_ref[...], preferred_element_type=jnp.float32) + b1_ref[...]
    h = _leaky_relu(_layer_norm(h, g1_ref[...], be1_ref[...]))

    # fc2 -> layernorm2 -> leaky_relu
    h = jnp.dot(h.astype(jnp.bfloat16), w2_ref[...],
                preferred_element_type=jnp.float32) + b2_ref[...]
    h = _leaky_relu(_layer_norm(h, g2_ref[...], be2_ref[...]))

    # fc3 -> layernorm3 -> leaky_relu
    h = jnp.dot(h.astype(jnp.bfloat16), w3_ref[...],
                preferred_element_type=jnp.float32) + b3_ref[...]
    h = _leaky_relu(_layer_norm(h, g3_ref[...], be3_ref[...]))

    # fc4 (N=1): VPU multiply + lane reduce (XLU) instead of a 1-column MXU pass.
    logits = jnp.sum(h * w4_ref[...], axis=-1, keepdims=True) + b4_ref[...]
    out_ref[...] = jax.nn.sigmoid(logits)                           # (tb, 1) f32


def discriminator_forward(x, params, *, tb=TB):
    B = x.shape[0]
    # Adaptive batch tile: keep sublane alignment (multiple of 8), cap at TB.
    tb = max(8, min(tb, pl.cdiv(B, 8) * 8))
    b_pad = pl.cdiv(B, tb) * tb

    # Pad features 42 -> 128 (zero rows in w1 make this exact) and batch -> tile
    # multiple; stream x as bf16 (halves the per-step DMA).
    x_p = jnp.pad(x.astype(jnp.float32),
                  ((0, b_pad - B), (0, K_PAD - K_IN))).astype(jnp.bfloat16)

    w1 = jnp.pad(params["w1"], ((0, K_PAD - K_IN), (0, 0))).astype(jnp.bfloat16)
    w2 = params["w2"].astype(jnp.bfloat16)
    w3 = params["w3"].astype(jnp.bfloat16)
    w4 = params["w4"].reshape(1, -1).astype(jnp.float32)            # (1, 128) row
    b1, b2, b3 = (params[k].reshape(1, -1) for k in ("b1", "b2", "b3"))
    b4 = params["b4"].reshape(1, 1)
    g1, g2, g3 = (params[k].reshape(1, -1) for k in ("g1", "g2", "g3"))
    be1, be2, be3 = (params[k].reshape(1, -1) for k in ("be1", "be2", "be3"))

    args = (x_p, w1, b1, g1, be1, w2, b2, g2, be2, w3, b3, g3, be3, w4, b4)

    def full(a):  # whole array, same block every step -> stays VMEM-resident
        return pl.BlockSpec(a.shape, lambda i, nd=a.ndim: (0,) * nd)

    grid = (b_pad // tb,)
    in_specs = ([pl.BlockSpec((tb, K_PAD), lambda i: (i, 0))]
                + [full(a) for a in args[1:]])
    out_specs = pl.BlockSpec((tb, 1), lambda i: (i, 0))

    flops = 2 * b_pad * (K_PAD * 512 + 512 * 256 + 256 * 128 + 128)
    bytes_accessed = (
        x_p.size * 2 + b_pad * 4
        + (w1.size + w2.size + w3.size) * 2
        + (w4.size + b1.size + b2.size + b3.size + b4.size
           + g1.size + g2.size + g3.size + be1.size + be2.size + be3.size) * 4
    )
    cost = pl.CostEstimate(flops=flops,
                           transcendentals=4 * b_pad,   # 3x rsqrt + 1x sigmoid per row
                           bytes_accessed=bytes_accessed)

    out = pl.pallas_call(
        discriminator_kernel,
        out_shape=jax.ShapeDtypeStruct((b_pad, 1), jnp.float32),
        grid=grid,
        in_specs=in_specs,
        out_specs=out_specs,
        compiler_params=pltpu.CompilerParams(
            dimension_semantics=("parallel",)),
        cost_estimate=cost,
    )(*args)
    return out[:B]


def discriminator_reference(x, params):
    """Pure-JAX f32 reference (eval-mode dropout)."""
    h = x @ params["w1"] + params["b1"]
    h = _leaky_relu(_layer_norm(h, params["g1"], params["be1"]))
    h = h @ params["w2"] + params["b2"]
    h = _leaky_relu(_layer_norm(h, params["g2"], params["be2"]))
    h = h @ params["w3"] + params["b3"]
    h = _leaky_relu(_layer_norm(h, params["g3"], params["be3"]))
    return jax.nn.sigmoid(h @ params["w4"] + params["b4"])


def init_params(key):
    """Deterministic params matching the PyTorch module's shapes.

    nn.Linear(in, out): weight (out, in), bias (out,) ~ U(-1/sqrt(in), 1/sqrt(in));
    stored here already transposed to (in, out).  nn.LayerNorm(d): gamma=1, beta=0.
    """
    dims = [(42, 512), (512, 256), (256, 128), (128, 1)]
    params = {}
    for idx, (fan_in, fan_out) in enumerate(dims, start=1):
        key, kw, kb = jax.random.split(key, 3)
        bound = 1.0 / jnp.sqrt(float(fan_in))
        params[f"w{idx}"] = jax.random.uniform(
            kw, (fan_in, fan_out), jnp.float32, -bound, bound)
        params[f"b{idx}"] = jax.random.uniform(
            kb, (fan_out,), jnp.float32, -bound, bound)
    for idx, d in zip((1, 2, 3), (512, 256, 128)):
        params[f"g{idx}"] = jnp.ones((d,), jnp.float32)
        params[f"be{idx}"] = jnp.zeros((d,), jnp.float32)
    return params


if __name__ == "__main__":
    key = jax.random.PRNGKey(0)
    key, kx = jax.random.split(key)
    B = 8
    x = jax.random.normal(kx, (B, K_IN), jnp.float32)
    params = init_params(key)

    out = jax.block_until_ready(discriminator_forward(x, params))
    ref = discriminator_reference(x, params)

    assert out.shape == (B, 1)
    assert bool(jnp.all(jnp.isfinite(out)))
    assert bool(jnp.all((out >= 0.0) & (out <= 1.0)))
    max_err = float(jnp.max(jnp.abs(out - ref)))
    assert max_err < 5e-2, f"max |kernel - reference| = {max_err}"

    print("KERNEL_OK")
</pallas_src>

<mosaic_0001>
module attributes {stable_mosaic.version = 11 : i64} {
  func.func @discriminator_kernel(%arg0: i32, %arg1: memref<8x128xbf16, #tpu.memory_space<vmem>>, %arg2: memref<128x512xbf16, #tpu.memory_space<vmem>>, %arg3: memref<1x512xf32, #tpu.memory_space<vmem>>, %arg4: memref<1x512xf32, #tpu.memory_space<vmem>>, %arg5: memref<1x512xf32, #tpu.memory_space<vmem>>, %arg6: memref<512x256xbf16, #tpu.memory_space<vmem>>, %arg7: memref<1x256xf32, #tpu.memory_space<vmem>>, %arg8: memref<1x256xf32, #tpu.memory_space<vmem>>, %arg9: memref<1x256xf32, #tpu.memory_space<vmem>>, %arg10: memref<256x128xbf16, #tpu.memory_space<vmem>>, %arg11: memref<1x128xf32, #tpu.memory_space<vmem>>, %arg12: memref<1x128xf32, #tpu.memory_space<vmem>>, %arg13: memref<1x128xf32, #tpu.memory_space<vmem>>, %arg14: memref<1x128xf32, #tpu.memory_space<vmem>>, %arg15: memref<1x1xf32, #tpu.memory_space<vmem>>, %arg16: memref<8x1xf32, #tpu.memory_space<vmem>>) attributes {dimension_semantics = [#tpu.dimension_semantics<parallel>], iteration_bounds = array<i64: 1>, scalar_prefetch = 0 : i64, scratch_operands = 0 : i64, tpu.core_type = #tpu.core_type<tc>, window_params = [{transform_indices = @transform_0, window_bounds = array<i64: 8, 128>}, {pipeline_mode = #tpu.pipeline_mode<synchronous>, transform_indices = @transform_1, window_bounds = array<i64: 128, 512>}, {pipeline_mode = #tpu.pipeline_mode<synchronous>, transform_indices = @transform_2, window_bounds = array<i64: 1, 512>}, {pipeline_mode = #tpu.pipeline_mode<synchronous>, transform_indices = @transform_3, window_bounds = array<i64: 1, 512>}, {pipeline_mode = #tpu.pipeline_mode<synchronous>, transform_indices = @transform_4, window_bounds = array<i64: 1, 512>}, {pipeline_mode = #tpu.pipeline_mode<synchronous>, transform_indices = @transform_5, window_bounds = array<i64: 512, 256>}, {pipeline_mode = #tpu.pipeline_mode<synchronous>, transform_indices = @transform_6, window_bounds = array<i64: 1, 256>}, {pipeline_mode = #tpu.pipeline_mode<synchronous>, transform_indices = @transform_7, window_bounds = array<i64: 1, 256>}, {pipeline_mode = #tpu.pipeline_mode<synchronous>, transform_indices = @transform_8, window_bounds = array<i64: 1, 256>}, {pipeline_mode = #tpu.pipeline_mode<synchronous>, transform_indices = @transform_9, window_bounds = array<i64: 256, 128>}, {pipeline_mode = #tpu.pipeline_mode<synchronous>, transform_indices = @transform_10, window_bounds = array<i64: 1, 128>}, {pipeline_mode = #tpu.pipeline_mode<synchronous>, transform_indices = @transform_11, window_bounds = array<i64: 1, 128>}, {pipeline_mode = #tpu.pipeline_mode<synchronous>, transform_indices = @transform_12, window_bounds = array<i64: 1, 128>}, {pipeline_mode = #tpu.pipeline_mode<synchronous>, transform_indices = @transform_13, window_bounds = array<i64: 1, 128>}, {pipeline_mode = #tpu.pipeline_mode<synchronous>, transform_indices = @transform_14, window_bounds = array<i64: 1, 1>}, {transform_indices = @transform_15, window_bounds = array<i64: 8, 1>}]} {
    %c0 = arith.constant 0 : index
    %c0_0 = arith.constant 0 : index
    %0 = vector.load %arg1[%c0, %c0_0] : memref<8x128xbf16, #tpu.memory_space<vmem>>, vector<8x128xbf16>
    %c0_1 = arith.constant 0 : index
    %c0_2 = arith.constant 0 : index
    %1 = vector.load %arg2[%c0_1, %c0_2] : memref<128x512xbf16, #tpu.memory_space<vmem>>, vector<128x512xbf16>
    %cst = arith.constant dense<0.000000e+00> : vector<8x512xf32>
    %2 = tpu.matmul %0, %1, %cst {dimension_numbers = #tpu.dot_dimension_numbers<[1], [0], [0], [1], [0, 0, 1, 1], [], []>} : vector<8x128xbf16>, vector<128x512xbf16>, vector<8x512xf32> -> vector<8x512xf32>
    %c0_3 = arith.constant 0 : index
    %c0_4 = arith.constant 0 : index
    %3 = vector.load %arg3[%c0_3, %c0_4] : memref<1x512xf32, #tpu.memory_space<vmem>>, vector<1x512xf32>
    %4 = vector.broadcast %3 : vector<1x512xf32> to vector<8x512xf32>
    %5 = arith.addf %2, %4 : vector<8x512xf32>
    %c0_5 = arith.constant 0 : index
    %c0_6 = arith.constant 0 : index
    %6 = vector.load %arg4[%c0_5, %c0_6] : memref<1x512xf32, #tpu.memory_space<vmem>>, vector<1x512xf32>
    %c0_7 = arith.constant 0 : index
    %c0_8 = arith.constant 0 : index
    %7 = vector.load %arg5[%c0_7, %c0_8] : memref<1x512xf32, #tpu.memory_space<vmem>>, vector<1x512xf32>
    %cst_9 = arith.constant dense<0.000000e+00> : vector<8xf32>
    %8 = vector.multi_reduction <add>, %5, %cst_9 [1] : vector<8x512xf32> to vector<8xf32>
    %9 = vector.shape_cast %8 : vector<8xf32> to vector<8x1xf32>
    %cst_10 = arith.constant 5.120000e+02 : f32
    %10 = vector.broadcast %cst_10 : f32 to vector<8x1xf32>
    %11 = arith.divf %9, %10 : vector<8x1xf32>
    %12 = vector.broadcast %11 : vector<8x1xf32> to vector<8x512xf32>
    %13 = arith.subf %5, %12 : vector<8x512xf32>
    %14 = arith.mulf %13, %13 : vector<8x512xf32>
    %cst_11 = arith.constant dense<0.000000e+00> : vector<8xf32>
    %15 = vector.multi_reduction <add>, %14, %cst_11 [1] : vector<8x512xf32> to vector<8xf32>
    %16 = vector.shape_cast %15 : vector<8xf32> to vector<8x1xf32>
    %cst_12 = arith.constant 5.120000e+02 : f32
    %17 = vector.broadcast %cst_12 : f32 to vector<8x1xf32>
    %18 = arith.divf %16, %17 : vector<8x1xf32>
    %cst_13 = arith.constant 9.99999974E-6 : f32
    %19 = vector.broadcast %cst_13 : f32 to vector<8x1xf32>
    %20 = arith.addf %18, %19 : vector<8x1xf32>
    %21 = math.rsqrt %20 : vector<8x1xf32>
    %22 = vector.broadcast %11 : vector<8x1xf32> to vector<8x512xf32>
    %23 = arith.subf %5, %22 : vector<8x512xf32>
    %24 = vector.broadcast %21 : vector<8x1xf32> to vector<8x512xf32>
    %25 = arith.mulf %23, %24 : vector<8x512xf32>
    %26 = vector.broadcast %6 : vector<1x512xf32> to vector<8x512xf32>
    %27 = arith.mulf %25, %26 : vector<8x512xf32>
    %28 = vector.broadcast %7 : vector<1x512xf32> to vector<8x512xf32>
    %29 = arith.addf %27, %28 : vector<8x512xf32>
    %cst_14 = arith.constant 0.000000e+00 : f32
    %30 = vector.broadcast %cst_14 : f32 to vector<8x512xf32>
    %31 = arith.cmpf oge, %29, %30 : vector<8x512xf32>
    %cst_15 = arith.constant 1.000000e-01 : f32
    %32 = vector.broadcast %cst_15 : f32 to vector<8x512xf32>
    %33 = arith.mulf %32, %29 : vector<8x512xf32>
    %34 = arith.select %31, %29, %33 : vector<8x512xi1>, vector<8x512xf32>
    %35 = arith.truncf %34 : vector<8x512xf32> to vector<8x512xbf16>
    %c0_16 = arith.constant 0 : index
    %c0_17 = arith.constant 0 : index
    %36 = vector.load %arg6[%c0_16, %c0_17] : memref<512x256xbf16, #tpu.memory_space<vmem>>, vector<512x256xbf16>
    %cst_18 = arith.constant dense<0.000000e+00> : vector<8x256xf32>
    %37 = tpu.matmul %35, %36, %cst_18 {dimension_numbers = #tpu.dot_dimension_numbers<[1], [0], [0], [1], [0, 0, 1, 1], [], []>} : vector<8x512xbf16>, vector<512x256xbf16>, vector<8x256xf32> -> vector<8x256xf32>
    %c0_19 = arith.constant 0 : index
    %c0_20 = arith.constant 0 : index
    %38 = vector.load %arg7[%c0_19, %c0_20] : memref<1x256xf32, #tpu.memory_space<vmem>>, vector<1x256xf32>
    %39 = vector.broadcast %38 : vector<1x256xf32> to vector<8x256xf32>
    %40 = arith.addf %37, %39 : vector<8x256xf32>
    %c0_21 = arith.constant 0 : index
    %c0_22 = arith.constant 0 : index
    %41 = vector.load %arg8[%c0_21, %c0_22] : memref<1x256xf32, #tpu.memory_space<vmem>>, vector<1x256xf32>
    %c0_23 = arith.constant 0 : index
    %c0_24 = arith.constant 0 : index
    %42 = vector.load %arg9[%c0_23, %c0_24] : memref<1x256xf32, #tpu.memory_space<vmem>>, vector<1x256xf32>
    %cst_25 = arith.constant dense<0.000000e+00> : vector<8xf32>
    %43 = vector.multi_reduction <add>, %40, %cst_25 [1] : vector<8x256xf32> to vector<8xf32>
    %44 = vector.shape_cast %43 : vector<8xf32> to vector<8x1xf32>
    %cst_26 = arith.constant 2.560000e+02 : f32
    %45 = vector.broadcast %cst_26 : f32 to vector<8x1xf32>
    %46 = arith.divf %44, %45 : vector<8x1xf32>
    %47 = vector.broadcast %46 : vector<8x1xf32> to vector<8x256xf32>
    %48 = arith.subf %40, %47 : vector<8x256xf32>
    %49 = arith.mulf %48, %48 : vector<8x256xf32>
    %cst_27 = arith.constant dense<0.000000e+00> : vector<8xf32>
    %50 = vector.multi_reduction <add>, %49, %cst_27 [1] : vector<8x256xf32> to vector<8xf32>
    %51 = vector.shape_cast %50 : vector<8xf32> to vector<8x1xf32>
    %cst_28 = arith.constant 2.560000e+02 : f32
    %52 = vector.broadcast %cst_28 : f32 to vector<8x1xf32>
    %53 = arith.divf %51, %52 : vector<8x1xf32>
    %cst_29 = arith.constant 9.99999974E-6 : f32
    %54 = vector.broadcast %cst_29 : f32 to vector<8x1xf32>
    %55 = arith.addf %53, %54 : vector<8x1xf32>
    %56 = math.rsqrt %55 : vector<8x1xf32>
    %57 = vector.broadcast %46 : vector<8x1xf32> to vector<8x256xf32>
    %58 = arith.subf %40, %57 : vector<8x256xf32>
    %59 = vector.broadcast %56 : vector<8x1xf32> to vector<8x256xf32>
    %60 = arith.mulf %58, %59 : vector<8x256xf32>
    %61 = vector.broadcast %41 : vector<1x256xf32> to vector<8x256xf32>
    %62 = arith.mulf %60, %61 : vector<8x256xf32>
    %63 = vector.broadcast %42 : vector<1x256xf32> to vector<8x256xf32>
    %64 = arith.addf %62, %63 : vector<8x256xf32>
    %cst_30 = arith.constant 0.000000e+00 : f32
    %65 = vector.broadcast %cst_30 : f32 to vector<8x256xf32>
    %66 = arith.cmpf oge, %64, %65 : vector<8x256xf32>
    %cst_31 = arith.constant 1.000000e-01 : f32
    %67 = vector.broadcast %cst_31 : f32 to vector<8x256xf32>
    %68 = arith.mulf %67, %64 : vector<8x256xf32>
    %69 = arith.select %66, %64, %68 : vector<8x256xi1>, vector<8x256xf32>
    %70 = arith.truncf %69 : vector<8x256xf32> to vector<8x256xbf16>
    %c0_32 = arith.constant 0 : index
    %c0_33 = arith.constant 0 : index
    %71 = vector.load %arg10[%c0_32, %c0_33] : memref<256x128xbf16, #tpu.memory_space<vmem>>, vector<256x128xbf16>
    %cst_34 = arith.constant dense<0.000000e+00> : vector<8x128xf32>
    %72 = tpu.matmul %70, %71, %cst_34 {dimension_numbers = #tpu.dot_dimension_numbers<[1], [0], [0], [1], [0, 0, 1, 1], [], []>} : vector<8x256xbf16>, vector<256x128xbf16>, vector<8x128xf32> -> vector<8x128xf32>
    %c0_35 = arith.constant 0 : index
    %c0_36 = arith.constant 0 : index
    %73 = vector.load %arg11[%c0_35, %c0_36] : memref<1x128xf32, #tpu.memory_space<vmem>>, vector<1x128xf32>
    %74 = vector.broadcast %73 : vector<1x128xf32> to vector<8x128xf32>
    %75 = arith.addf %72, %74 : vector<8x128xf32>
    %c0_37 = arith.constant 0 : index
    %c0_38 = arith.constant 0 : index
    %76 = vector.load %arg12[%c0_37, %c0_38] : memref<1x128xf32, #tpu.memory_space<vmem>>, vector<1x128xf32>
    %c0_39 = arith.constant 0 : index
    %c0_40 = arith.constant 0 : index
    %77 = vector.load %arg13[%c0_39, %c0_40] : memref<1x128xf32, #tpu.memory_space<vmem>>, vector<1x128xf32>
    %cst_41 = arith.constant dense<0.000000e+00> : vector<8xf32>
    %78 = vector.multi_reduction <add>, %75, %cst_41 [1] : vector<8x128xf32> to vector<8xf32>
    %79 = vector.shape_cast %78 : vector<8xf32> to vector<8x1xf32>
    %cst_42 = arith.constant 1.280000e+02 : f32
    %80 = vector.broadcast %cst_42 : f32 to vector<8x1xf32>
    %81 = arith.divf %79, %80 : vector<8x1xf32>
    %82 = vector.broadcast %81 : vector<8x1xf32> to vector<8x128xf32>
    %83 = arith.subf %75, %82 : vector<8x128xf32>
    %84 = arith.mulf %83, %83 : vector<8x128xf32>
    %cst_43 = arith.constant dense<0.000000e+00> : vector<8xf32>
    %85 = vector.multi_reduction <add>, %84, %cst_43 [1] : vector<8x128xf32> to vector<8xf32>
    %86 = vector.shape_cast %85 : vector<8xf32> to vector<8x1xf32>
    %cst_44 = arith.constant 1.280000e+02 : f32
    %87 = vector.broadcast %cst_44 : f32 to vector<8x1xf32>
    %88 = arith.divf %86, %87 : vector<8x1xf32>
    %cst_45 = arith.constant 9.99999974E-6 : f32
    %89 = vector.broadcast %cst_45 : f32 to vector<8x1xf32>
    %90 = arith.addf %88, %89 : vector<8x1xf32>
    %91 = math.rsqrt %90 : vector<8x1xf32>
    %92 = vector.broadcast %81 : vector<8x1xf32> to vector<8x128xf32>
    %93 = arith.subf %75, %92 : vector<8x128xf32>
    %94 = vector.broadcast %91 : vector<8x1xf32> to vector<8x128xf32>
    %95 = arith.mulf %93, %94 : vector<8x128xf32>
    %96 = vector.broadcast %76 : vector<1x128xf32> to vector<8x128xf32>
    %97 = arith.mulf %95, %96 : vector<8x128xf32>
    %98 = vector.broadcast %77 : vector<1x128xf32> to vector<8x128xf32>
    %99 = arith.addf %97, %98 : vector<8x128xf32>
    %cst_46 = arith.constant 0.000000e+00 : f32
    %100 = vector.broadcast %cst_46 : f32 to vector<8x128xf32>
    %101 = arith.cmpf oge, %99, %100 : vector<8x128xf32>
    %cst_47 = arith.constant 1.000000e-01 : f32
    %102 = vector.broadcast %cst_47 : f32 to vector<8x128xf32>
    %103 = arith.mulf %102, %99 : vector<8x128xf32>
    %104 = arith.select %101, %99, %103 : vector<8x128xi1>, vector<8x128xf32>
    %c0_48 = arith.constant 0 : index
    %c0_49 = arith.constant 0 : index
    %105 = vector.load %arg14[%c0_48, %c0_49] : memref<1x128xf32, #tpu.memory_space<vmem>>, vector<1x128xf32>
    %106 = vector.broadcast %105 : vector<1x128xf32> to vector<8x128xf32>
    %107 = arith.mulf %104, %106 : vector<8x128xf32>
    %cst_50 = arith.constant dense<0.000000e+00> : vector<8xf32>
    %108 = vector.multi_reduction <add>, %107, %cst_50 [1] : vector<8x128xf32> to vector<8xf32>
    %109 = vector.shape_cast %108 : vector<8xf32> to vector<8x1xf32>
    %c0_51 = arith.constant 0 : index
    %c0_52 = arith.constant 0 : index
    %110 = vector.load %arg15[%c0_51, %c0_52] : memref<1x1xf32, #tpu.memory_space<vmem>>, vector<1x1xf32>
    %111 = vector.broadcast %110 : vector<1x1xf32> to vector<8x1xf32>
    %112 = arith.addf %109, %111 : vector<8x1xf32>
    %113 = arith.negf %112 : vector<8x1xf32>
    %114 = math.exp %113 : vector<8x1xf32>
    %cst_53 = arith.constant 1.000000e+00 : f32
    %115 = vector.broadcast %cst_53 : f32 to vector<8x1xf32>
    %116 = arith.addf %115, %114 : vector<8x1xf32>
    %117 = arith.divf %115, %116 : vector<8x1xf32>
    %c0_54 = arith.constant 0 : index
    %c0_55 = arith.constant 0 : index
    %118 = vector.load %arg16[%c0_54, %c0_55] : memref<8x1xf32, #tpu.memory_space<vmem>>, vector<8x1xf32>
    tpu.vector_store %arg16[%c0_54, %c0_55], %117 {strides = array<i32>} : memref<8x1xf32, #tpu.memory_space<vmem>>, vector<8x1xf32>,
    return
  }
  func.func @transform_0(%arg0: i32) -> (i32, i32) {
    %c0_i32 = arith.constant 0 : i32
    %c0_i32_0 = arith.constant 0 : i32
    return %arg0, %c0_i32 : i32, i32
  }
  func.func @transform_1(%arg0: i32) -> (i32, i32) {
    %c0_i32 = arith.constant 0 : i32
    %c0_i32_0 = arith.constant 0 : i32
    %c0_i32_1 = arith.constant 0 : i32
    return %c0_i32, %c0_i32_0 : i32, i32
  }
  func.func @transform_2(%arg0: i32) -> (i32, i32) {
    %c0_i32 = arith.constant 0 : i32
    %c0_i32_0 = arith.constant 0 : i32
    %c0_i32_1 = arith.constant 0 : i32
    return %c0_i32, %c0_i32_0 : i32, i32
  }
  func.func @transform_3(%arg0: i32) -> (i32, i32) {
    %c0_i32 = arith.constant 0 : i32
    %c0_i32_0 = arith.constant 0 : i32
    %c0_i32_1 = arith.constant 0 : i32
    return %c0_i32, %c0_i32_0 : i32, i32
  }
  func.func @transform_4(%arg0: i32) -> (i32, i32) {
    %c0_i32 = arith.constant 0 : i32
    %c0_i32_0 = arith.constant 0 : i32
    %c0_i32_1 = arith.constant 0 : i32
    return %c0_i32, %c0_i32_0 : i32, i32
  }
  func.func @transform_5(%arg0: i32) -> (i32, i32) {
    %c0_i32 = arith.constant 0 : i32
    %c0_i32_0 = arith.constant 0 : i32
    %c0_i32_1 = arith.constant 0 : i32
    return %c0_i32, %c0_i32_0 : i32, i32
  }
  func.func @transform_6(%arg0: i32) -> (i32, i32) {
    %c0_i32 = arith.constant 0 : i32
    %c0_i32_0 = arith.constant 0 : i32
    %c0_i32_1 = arith.constant 0 : i32
    return %c0_i32, %c0_i32_0 : i32, i32
  }
  func.func @transform_7(%arg0: i32) -> (i32, i32) {
    %c0_i32 = arith.constant 0 : i32
    %c0_i32_0 = arith.constant 0 : i32
    %c0_i32_1 = arith.constant 0 : i32
    return %c0_i32, %c0_i32_0 : i32, i32
  }
  func.func @transform_8(%arg0: i32) -> (i32, i32) {
    %c0_i32 = arith.constant 0 : i32
    %c0_i32_0 = arith.constant 0 : i32
    %c0_i32_1 = arith.constant 0 : i32
    return %c0_i32, %c0_i32_0 : i32, i32
  }
  func.func @transform_9(%arg0: i32) -> (i32, i32) {
    %c0_i32 = arith.constant 0 : i32
    %c0_i32_0 = arith.constant 0 : i32
    %c0_i32_1 = arith.constant 0 : i32
    return %c0_i32, %c0_i32_0 : i32, i32
  }
  func.func @transform_10(%arg0: i32) -> (i32, i32) {
    %c0_i32 = arith.constant 0 : i32
    %c0_i32_0 = arith.constant 0 : i32
    %c0_i32_1 = arith.constant 0 : i32
    return %c0_i32, %c0_i32_0 : i32, i32
  }
  func.func @transform_11(%arg0: i32) -> (i32, i32) {
    %c0_i32 = arith.constant 0 : i32
    %c0_i32_0 = arith.constant 0 : i32
    %c0_i32_1 = arith.constant 0 : i32
    return %c0_i32, %c0_i32_0 : i32, i32
  }
  func.func @transform_12(%arg0: i32) -> (i32, i32) {
    %c0_i32 = arith.constant 0 : i32
    %c0_i32_0 = arith.constant 0 : i32
    %c0_i32_1 = arith.constant 0 : i32
    return %c0_i32, %c0_i32_0 : i32, i32
  }
  func.func @transform_13(%arg0: i32) -> (i32, i32) {
    %c0_i32 = arith.constant 0 : i32
    %c0_i32_0 = arith.constant 0 : i32
    %c0_i32_1 = arith.constant 0 : i32
    return %c0_i32, %c0_i32_0 : i32, i32
  }
  func.func @transform_14(%arg0: i32) -> (i32, i32) {
    %c0_i32 = arith.constant 0 : i32
    %c0_i32_0 = arith.constant 0 : i32
    %c0_i32_1 = arith.constant 0 : i32
    return %c0_i32, %c0_i32_0 : i32, i32
  }
  func.func @transform_15(%arg0: i32) -> (i32, i32) {
    %c0_i32 = arith.constant 0 : i32
    %c0_i32_0 = arith.constant 0 : i32
    return %arg0, %c0_i32 : i32, i32
  }
}

</mosaic_0001>

<bundles_post_ra>
// kernel: tpu_custom_call.1
= control target key start
LH: loop header
LB: loop body
LE: loop exit
PB: predicated region body
PF: predicated region fallthrough
CT: control target
= control target key end

     0   :  { %s2246_s0 = inlined_call_operand.hbm [shape: bf16[8,128], index: 0, kind: input, shape index: {}]   ;;  %s2247_s1 = inlined_call_operand.hbm [shape: bf16[128,512], index: 1, kind: input, shape index: {}]   ;;  %s2248_s2 = inlined_call_operand.hbm [shape: f32[1,512], index: 2, kind: input, shape index: {}]   ;;  %s2249_s3 = inlined_call_operand.vmem [shape: f32[1,512], index: 3, kind: input, shape index: {}]   ;;  %s2250_s4 = inlined_call_operand.hbm [shape: f32[1,512], index: 4, kind: input, shape index: {}]   ;;  %s2251_s5 = inlined_call_operand.hbm [shape: bf16[512,256], index: 5, kind: input, shape index: {}]   ;;  %s2252_s6 = inlined_call_operand.vmem [shape: f32[1,256], index: 6, kind: input, shape index: {}]   ;;  %s2253_s7 = inlined_call_operand.vmem [shape: f32[1,256], index: 7, kind: input, shape index: {}]   ;;  %s2254_s8 = inlined_call_operand.hbm [shape: f32[1,256], index: 8, kind: input, shape index: {}]   ;;  %s2255_s9 = inlined_call_operand.hbm [shape: bf16[256,128], index: 9, kind: input, shape index: {}]   ;;  %s2256_s10 = inlined_call_operand.vmem [shape: f32[1,128], index: 10, kind: input, shape index: {}]   ;;  %s2257_s11 = inlined_call_operand.vmem [shape: f32[1,128], index: 11, kind: input, shape index: {}]   ;;  %s2258_s12 = inlined_call_operand.vmem [shape: f32[1,128], index: 12, kind: input, shape index: {}]   ;;  %s2259_s13 = inlined_call_operand.vmem [shape: f32[1,128], index: 13, kind: input, shape index: {}]   ;;  %s2260_s14 = inlined_call_operand.<no memory space> [shape: f32[1,1], index: 14, kind: input, shape index: {}]   ;;  %s2261_s15 = inlined_call_operand.vmem [shape: f32[8,1], index: 15, kind: output, shape index: {}]  }
   0x1   :  { %v20_v0 = vstv %s2260_s14 }
   0x2   :  { %21 = vst [vmem:[#allocation2] sm:$0x1] %v20_v0 }
   0x3   :  { %22 = vsyncpa [#allocation4], 0 }
   0x4   :  { %23 = vsyncpa [#allocation6], 0 }
   0x5   :  { %24 = vsyncpa [#allocation9], 0  ;;  %s41_s22 = sshll.u32 %s2247_s1, 4  ;;  %s42_s22 = int_to_ptr.hbm [resolvable:$true] %s41_s22 }
   0x6   :  { %25 = vsyncpa [#allocation12], 0  ;;  %s2057_s23 = smov [#allocation5]   ;;  %s68_s27 = sshll.u32 %s2250_s4, 4  ;;  %s69_s27 = int_to_ptr.hbm [resolvable:$true] %s68_s27 }
   0x7   :  { %s43_s24 = sshll.u32 %s2057_s23, 4  ;;  %s2058_s28 = smov 256   ;;  %s44_s24 = int_to_ptr.vmem [resolvable:$true] %s43_s24 }
   0x8   :  { %s2059_s29 = smov 16   ;;  %s2060_s14 = smov [#allocation8]  }
   0x9   :  { %49 = dma.hbm_to_vmem [thread:$0]  %s42_s22, 4096, %s44_s24, [#allocation6], %s2058_s28, %s2058_s28, %s2059_s29  }
   0xa   :  { %s70_s30 = sshll.u32 %s2060_s14, 4  ;;  %s96_s18 = sshll.u32 %s2254_s8, 4  ;;  %s71_s30 = int_to_ptr.vmem [resolvable:$true] %s70_s30  ;;  %s97_s18 = int_to_ptr.hbm [resolvable:$true] %s96_s18 }
   0xb   :  { %73 = dma.hbm_to_vmem [thread:$0]  %s69_s27, 64, %s71_s30, [#allocation9]  }
   0xc   :  { %s31_s20 = sshll.u32 %s2246_s0, 4  ;;  %s2061_s21 = smov [#allocation11]   ;;  %s32_s20 = int_to_ptr.hbm [resolvable:$true] %s31_s20 }
   0xd   :  { %s98_s23 = sshll.u32 %s2061_s21, 4  ;;  %s2062_s4 = smov [#allocation3]   ;;  %s99_s23 = int_to_ptr.vmem [resolvable:$true] %s98_s23 }
   0xe   :  { %101 = dma.hbm_to_vmem [thread:$0]  %s97_s18, 32, %s99_s23, [#allocation12]  }
   0xf   :  { %s33_s22 = sshll.u32 %s2062_s4, 4  ;;  %s55_s26 = sshll.u32 %s2248_s2, 4  ;;  %s34_s22 = int_to_ptr.vmem [resolvable:$true] %s33_s22  ;;  %s56_s26 = int_to_ptr.hbm [resolvable:$true] %s55_s26 }
  0x10   :  { %36 = dma.hbm_to_vmem [thread:$0]  %s32_s20, 64, %s34_s22, [#allocation4]  }
  0x11   :  { %s78_s28 = sshll.u32 %s2251_s5, 4  ;;  %s2063_s29 = smov [#allocation7]   ;;  %s79_s28 = int_to_ptr.hbm [resolvable:$true] %s78_s28 }
  0x12   :  { %s57_s0 = sshll.u32 %s2063_s29, 4  ;;  %s2064_s14 = smov [#allocation10]   ;;  %s58_s0 = int_to_ptr.vmem [resolvable:$true] %s57_s0 }
  0x13   :  { %60 = dma.hbm_to_vmem [thread:$0]  %s56_s26, 64, %s58_s0, [#allocation6]  }
  0x14   :  { %s80_s30 = sshll.u32 %s2064_s14, 4  ;;  %s2065_s16 = smov 128   ;;  %s81_s30 = int_to_ptr.vmem [resolvable:$true] %s80_s30 }
  0x15   :  { %s2066_s17 = smov 8   ;;  %s106_s1 = sshll.u32 %s2255_s9, 4  ;;  %s107_s1 = int_to_ptr.hbm [resolvable:$true] %s106_s1 }
  0x16   :  { %86 = dma.hbm_to_vmem [thread:$0]  %s79_s28, 8192, %s81_s30, [#allocation9], %s2065_s16, %s2065_s16, %s2066_s17  }
  0x17   :  { %s2067_s19 = smov [#allocation13]   ;;  %s2068_s5 = smov 64  }
  0x18   :  { %s108_s20 = sshll.u32 %s2067_s19, 4  ;;  %s2069_s21 = smov 4   ;;  %s109_s20 = int_to_ptr.vmem [resolvable:$true] %s108_s20 }
  0x19   :  { %114 = dma.hbm_to_vmem [thread:$0]  %s107_s1, 2048, %s109_s20, [#allocation12], %s2068_s5, %s2068_s5, %s2069_s21  }
  0x1a   :  { %2049 = dma.done.wait [#allocation4], 64  }
  0x1b   :  { %2050 = vsyncadd [#allocation4], 4294967232 }
  0x1c   :  { %2051 = dma.done.wait [#allocation6], 4160  }
  0x1d   :  { %2052 = vsyncadd [#allocation6], 4294963136 }
  0x1e   :  { %2053 = dma.done.wait [#allocation9], 8256  }
  0x1f   :  { %2054 = vsyncadd [#allocation9], 4294959040 }
  0x20   :  { %2055 = dma.done.wait [#allocation12], 2080  }
  0x21   :  { %2056 = vsyncadd [#allocation12], 4294965216  ;;  %v1397_v1 = vld [vmem:[#allocation5 + $0xe0] sm:$0xf]  ;;  %v1762_v2 = vld [vmem:[#allocation5 + $0xec] sm:$0xf0] }
  0x22   :  { %v1760_v3 = vld [vmem:[#allocation5 + $0xe4] sm:$0xf]  ;;  %v1398_v4 = vor.u32 %v1762_v2, %v1397_v1  ;;  %v1399_v5 = vld [vmem:[#allocation5 + $0xf0] sm:$0xf0]  ;;  %v1405_v6 = vld [vmem:[#allocation5 + $0xe8] sm:$0xf] }
  0x23   :  { %v1763_v7 = vld [vmem:[#allocation5 + $0xf4] sm:$0xf0]  ;;  %v1402_v8 = vor.u32 %v1760_v3, %v1399_v5  ;;  %v1761_v10 = vld [vmem:[#allocation5 + $0xec] sm:$0xf]  ;;  %v1407_v11 = vld [vmem:[#allocation5 + $0xf8] sm:$0xf0] }
  0x24   :  { %v1406_v9 = vor.u32 %v1763_v7, %v1405_v6  ;;  %v1381_v12 = vld [vmem:[#allocation5 + $0xc0] sm:$0xf]  ;;  %356 = vmatpush.bf16.msra.mxu0 %v1398_v4  ;;  %v1410_v13 = vor.u32 %v1761_v10, %v1407_v11  ;;  %v1758_v14 = vld [vmem:[#allocation5 + $0xcc] sm:$0xf0]  ;;  %v1756_v15 = vld [vmem:[#allocation5 + $0xc4] sm:$0xf] }
  0x25   :  { %v1383_v16 = vld [vmem:[#allocation5 + $0xd0] sm:$0xf0]  ;;  %369 = vmatpush.bf16.msra.mxu1 %v1402_v8  ;;  %v1382_v17 = vor.u32 %v1758_v14, %v1381_v12  ;;  %v1389_v19 = vld [vmem:[#allocation5 + $0xc8] sm:$0xf]  ;;  %v1759_v20 = vld [vmem:[#allocation5 + $0xd4] sm:$0xf0] }
  0x26   :  { %382 = vmatpush.bf16.msra.mxu2 %v1406_v9  ;;  %v1386_v18 = vor.u32 %v1756_v15, %v1383_v16  ;;  %v1757_v21 = vld [vmem:[#allocation5 + $0xcc] sm:$0xf]  ;;  %395 = vmatpush.bf16.msra.mxu3 %v1410_v13  ;;  %v1390_v22 = vor.u32 %v1759_v20, %v1389_v19  ;;  %v1391_v23 = vld [vmem:[#allocation5 + $0xd8] sm:$0xf0]  ;;  %v1365_v24 = vld [vmem:[#allocation5 + $0xa0] sm:$0xf] }
  0x27   :  { %v1754_v25 = vld [vmem:[#allocation5 + $0xac] sm:$0xf0]  ;;  %v1394_v26 = vor.u32 %v1757_v21, %v1391_v23  ;;  %v1752_v27 = vld [vmem:[#allocation5 + $0xa4] sm:$0xf]  ;;  %v1367_v28 = vld [vmem:[#allocation5 + $0xb0] sm:$0xf0] }
  0x28   :  { %v1373_v29 = vld [vmem:[#allocation5 + $0xa8] sm:$0xf]  ;;  %357 = vmatpush.bf16.msra.mxu0 %v1382_v17  ;;  %v1366_v30 = vor.u32 %v1754_v25, %v1365_v24  ;;  %v1755_v31 = vld [vmem:[#allocation5 + $0xb4] sm:$0xf0]  ;;  %v1753_v32 = vld [vmem:[#allocation5 + $0xac] sm:$0xf]  ;;  %v1370_v34 = vor.u32 %v1752_v27, %v1367_v28 }
  0x29   :  { %v1375_v33 = vld [vmem:[#allocation5 + $0xb8] sm:$0xf0]  ;;  %370 = vmatpush.bf16.msra.mxu1 %v1386_v18  ;;  %v1374_v35 = vor.u32 %v1755_v31, %v1373_v29  ;;  %v1349_v36 = vld [vmem:[#allocation5 + $0x80] sm:$0xf]  ;;  %v1750_v37 = vld [vmem:[#allocation5 + $0x8c] sm:$0xf0] }
  0x2a   :  { %383 = vmatpush.bf16.msra.mxu2 %v1390_v22  ;;  %v1748_v38 = vld [vmem:[#allocation5 + $0x84] sm:$0xf]  ;;  %396 = vmatpush.bf16.msra.mxu3 %v1394_v26  ;;  %v1378_v39 = vor.u32 %v1753_v32, %v1375_v33  ;;  %v1351_v40 = vld [vmem:[#allocation5 + $0x90] sm:$0xf0]  ;;  %v1357_v41 = vld [vmem:[#allocation5 + $0x88] sm:$0xf]  ;;  %v1350_v45 = vor.u32 %v1750_v37, %v1349_v36 }
  0x2b   :  { %v1751_v42 = vld [vmem:[#allocation5 + $0x94] sm:$0xf0]  ;;  %v1749_v43 = vld [vmem:[#allocation5 + $0x8c] sm:$0xf]  ;;  %v1359_v44 = vld [vmem:[#allocation5 + $0x98] sm:$0xf0]  ;;  %v1354_v46 = vor.u32 %v1748_v38, %v1351_v40 }
  0x2c   :  { %358 = vmatpush.bf16.msra.mxu0 %v1366_v30  ;;  %v1358_v47 = vor.u32 %v1751_v42, %v1357_v41  ;;  %v1333_v48 = vld [vmem:[#allocation5 + $0x60] sm:$0xf]  ;;  %v1746_v49 = vld [vmem:[#allocation5 + $0x6c] sm:$0xf0]  ;;  %v1744_v50 = vld [vmem:[#allocation5 + $0x64] sm:$0xf]  ;;  %v1362_v51 = vor.u32 %v1749_v43, %v1359_v44 }
  0x2d   :  { %371 = vmatpush.bf16.msra.mxu1 %v1370_v34  ;;  %v1335_v52 = vld [vmem:[#allocation5 + $0x70] sm:$0xf0]  ;;  %v1341_v53 = vld [vmem:[#allocation5 + $0x68] sm:$0xf]  ;;  %v1747_v54 = vld [vmem:[#allocation5 + $0x74] sm:$0xf0]  ;;  %v1334_v57 = vor.u32 %v1746_v49, %v1333_v48 }
  0x2e   :  { %384 = vmatpush.bf16.msra.mxu2 %v1374_v35  ;;  %397 = vmatpush.bf16.msra.mxu3 %v1378_v39  ;;  %v1745_v55 = vld [vmem:[#allocation5 + $0x6c] sm:$0xf]  ;;  %v1343_v56 = vld [vmem:[#allocation5 + $0x78] sm:$0xf0]  ;;  %v1338_v58 = vor.u32 %v1744_v50, %v1335_v52  ;;  %v1342_v59 = vor.u32 %v1747_v54, %v1341_v53  ;;  %v1317_v60 = vld [vmem:[#allocation5 + $0x40] sm:$0xf] }
  0x2f   :  { %v1742_v61 = vld [vmem:[#allocation5 + $0x4c] sm:$0xf0]  ;;  %v1740_v62 = vld [vmem:[#allocation5 + $0x44] sm:$0xf]  ;;  %v1346_v63 = vor.u32 %v1745_v55, %v1343_v56  ;;  %v1319_v0 = vld [vmem:[#allocation5 + $0x50] sm:$0xf0] }
  0x30   :  { %359 = vmatpush.bf16.msra.mxu0 %v1350_v45  ;;  %v1325_v1 = vld [vmem:[#allocation5 + $0x48] sm:$0xf]  ;;  %v1743_v2 = vld [vmem:[#allocation5 + $0x54] sm:$0xf0]  ;;  %v1741_v3 = vld [vmem:[#allocation5 + $0x4c] sm:$0xf]  ;;  %v1318_v5 = vor.u32 %v1742_v61, %v1317_v60  ;;  %v1322_v7 = vor.u32 %v1740_v62, %v1319_v0 }
  0x31   :  { %372 = vmatpush.bf16.msra.mxu1 %v1354_v46  ;;  %v1327_v4 = vld [vmem:[#allocation5 + $0x58] sm:$0xf0]  ;;  %v1301_v6 = vld [vmem:[#allocation5 + $0x20] sm:$0xf]  ;;  %v1326_v8 = vor.u32 %v1743_v2, %v1325_v1  ;;  %v1738_v9 = vld [vmem:[#allocation5 + $0x2c] sm:$0xf0] }
  0x32   :  { %385 = vmatpush.bf16.msra.mxu2 %v1358_v47  ;;  %398 = vmatpush.bf16.msra.mxu3 %v1362_v51  ;;  %v1736_v10 = vld [vmem:[#allocation5 + $0x24] sm:$0xf]  ;;  %v1303_v11 = vld [vmem:[#allocation5 + $0x30] sm:$0xf0]  ;;  %v1330_v12 = vor.u32 %v1741_v3, %v1327_v4  ;;  %v1309_v13 = vld [vmem:[#allocation5 + $0x28] sm:$0xf]  ;;  %v1302_v17 = vor.u32 %v1738_v9, %v1301_v6 }
  0x33   :  { %v1739_v14 = vld [vmem:[#allocation5 + $0x34] sm:$0xf0]  ;;  %v1737_v15 = vld [vmem:[#allocation5 + $0x2c] sm:$0xf]  ;;  %v1311_v16 = vld [vmem:[#allocation5 + $0x38] sm:$0xf0]  ;;  %v1306_v18 = vor.u32 %v1736_v10, %v1303_v11 }
  0x34   :  { %360 = vmatpush.bf16.msra.mxu0 %v1334_v57  ;;  %v1310_v19 = vor.u32 %v1739_v14, %v1309_v13  ;;  %v1285_v20 = vld [vmem:[#allocation5] sm:$0xf]  ;;  %v1734_v21 = vld [vmem:[#allocation5 + $0xc] sm:$0xf0]  ;;  %v1732_v22 = vld [vmem:[#allocation5 + $0x4] sm:$0xf]  ;;  %v1314_v23 = vor.u32 %v1737_v15, %v1311_v16 }
  0x35   :  { %373 = vmatpush.bf16.msra.mxu1 %v1338_v58  ;;  %v1287_v24 = vld [vmem:[#allocation5 + $0x10] sm:$0xf0]  ;;  %v1293_v25 = vld [vmem:[#allocation5 + $0x8] sm:$0xf]  ;;  %v1735_v26 = vld [vmem:[#allocation5 + $0x14] sm:$0xf0]  ;;  %v1286_v29 = vor.u32 %v1734_v21, %v1285_v20 }
  0x36   :  { %386 = vmatpush.bf16.msra.mxu2 %v1342_v59  ;;  %399 = vmatpush.bf16.msra.mxu3 %v1346_v63  ;;  %v1733_v27 = vld [vmem:[#allocation5 + $0xc] sm:$0xf]  ;;  %v1295_v28 = vld [vmem:[#allocation5 + $0x18] sm:$0xf0]  ;;  %v1290_v30 = vor.u32 %v1732_v22, %v1287_v24  ;;  %v1294_v31 = vor.u32 %v1735_v26, %v1293_v25  ;;  %v186_v34 = vld [vmem:[#allocation7] sm:$0xf] }
  0x37   :  { %v1298_v32 = vor.u32 %v1733_v27, %v1295_v28  ;;  %v153_v33 = vld [vmem:[#allocation3] sm:$0xf]  ;;  %v188_v35 = vperm.slane %v186_v34, 0  ;;  %v189_v36 = vperm.slane %v186_v34, 1  ;;  %v190_v41 = vperm.slane %v186_v34, 2 }
  0x38   :  { %361 = vmatpush.bf16.msra.mxu0 %v1318_v5  ;;  %v191_v42 = vperm.slane %v186_v34, 3  ;;  %v2070_v54 = vmov 512.0   ;;  %v1469_v58 = vld [vmem:[#allocation10 + $0x70] sm:$0xf]  ;;  %v1779_v59 = vld [vmem:[#allocation10 + $0x74] sm:$0xf0] }
  0x39   :  { %374 = vmatpush.bf16.msra.mxu1 %v1322_v7  ;;  %1865 = vrcp.f32 %v2070_v54  ;;  %v1533_v60 = vld [vmem:[#allocation10 + $0xf0] sm:$0xf]  ;;  %v1470_v61 = vor.u32 %v1779_v59, %v1469_v58  ;;  %v1795_v62 = vld [vmem:[#allocation10 + $0xf4] sm:$0xf0]  ;;  %v1461_v5 = vld [vmem:[#allocation10 + $0x60] sm:$0xf] }
  0x3a   :  { %387 = vmatpush.bf16.msra.mxu2 %v1326_v8  ;;  %400 = vmatpush.bf16.msra.mxu3 %v1330_v12  ;;  %v1597_v63 = vld [vmem:[#allocation10 + $0x170] sm:$0xf]  ;;  %v1811_v0 = vld [vmem:[#allocation10 + $0x174] sm:$0xf0]  ;;  %v1534_v1 = vor.u32 %v1795_v62, %v1533_v60  ;;  %v1777_v7 = vld [vmem:[#allocation10 + $0x64] sm:$0xf0] }
  0x3b   :  { %v1598_v2 = vor.u32 %v1811_v0, %v1597_v63  ;;  %v1661_v3 = vld [vmem:[#allocation10 + $0x1f0] sm:$0xf]  ;;  %v1827_v4 = vld [vmem:[#allocation10 + $0x1f4] sm:$0xf0]  ;;  %v1525_v8 = vld [vmem:[#allocation10 + $0xe0] sm:$0xf]  ;;  %v1462_v10 = vor.u32 %v1777_v7, %v1461_v5 }
  0x3c   :  { %362 = vmatpush.bf16.msra.mxu0 %v1302_v17  ;;  %v1662_v6 = vor.u32 %v1827_v4, %v1661_v3  ;;  %v1793_v9 = vld [vmem:[#allocation10 + $0xe4] sm:$0xf0]  ;;  %v1589_v12 = vld [vmem:[#allocation10 + $0x160] sm:$0xf]  ;;  %v1453_v17 = vld [vmem:[#allocation10 + $0x50] sm:$0xf] }
  0x3d   :  { %375 = vmatpush.bf16.msra.mxu1 %v1306_v18  ;;  %v1526_v11 = vor.u32 %v1793_v9, %v1525_v8  ;;  %v1809_v13 = vld [vmem:[#allocation10 + $0x164] sm:$0xf0]  ;;  %v1653_v14 = vld [vmem:[#allocation10 + $0x1e0] sm:$0xf]  ;;  %v1775_v18 = vld [vmem:[#allocation10 + $0x54] sm:$0xf0] }
  0x3e   :  { %388 = vmatpush.bf16.msra.mxu2 %v1310_v19  ;;  %401 = vmatpush.bf16.msra.mxu3 %v1314_v23  ;;  %v1590_v15 = vor.u32 %v1809_v13, %v1589_v12  ;;  %v1825_v16 = vld [vmem:[#allocation10 + $0x1e4] sm:$0xf0]  ;;  %v1517_v20 = vld [vmem:[#allocation10 + $0xd0] sm:$0xf]  ;;  %v1791_v21 = vld [vmem:[#allocation10 + $0xd4] sm:$0xf0]  ;;  %v1454_v23 = vor.u32 %v1775_v18, %v1453_v17 }
  0x3f   :  { %v1866_v55 = vpop.eup %1865  ;;  %v1654_v19 = vor.u32 %v1825_v16, %v1653_v14  ;;  %v1581_v22 = vld [vmem:[#allocation10 + $0x150] sm:$0xf]  ;;  %v1807_v24 = vld [vmem:[#allocation10 + $0x154] sm:$0xf0]  ;;  %v1518_v27 = vor.u32 %v1791_v21, %v1517_v20  ;;  %v1769_v7 = vld [vmem:[#allocation10 + $0x24] sm:$0xf0] }
  0x40   :  { %363 = vmatpush.bf16.msra.mxu0 %v1286_v29  ;;  %v416_v56 = vmul.f32 512.0, %v1866_v55  ;;  %v1645_v25 = vld [vmem:[#allocation10 + $0x1d0] sm:$0xf]  ;;  %v1823_v26 = vld [vmem:[#allocation10 + $0x1d4] sm:$0xf0]  ;;  %v1582_v28 = vor.u32 %v1807_v24, %v1581_v22  ;;  %vm420_vm0 = vweird.f32 %v1866_v55 }
  0x41   :  { %376 = vmatpush.bf16.msra.mxu1 %v1290_v30  ;;  %v1646_v30 = vor.u32 %v1823_v26, %v1645_v25  ;;  %v1437_v58 = vld [vmem:[#allocation10 + $0x30] sm:$0xf]  ;;  %v1771_v59 = vld [vmem:[#allocation10 + $0x34] sm:$0xf0]  ;;  %v1493_v8 = vld [vmem:[#allocation10 + $0xa0] sm:$0xf] }
  0x42   :  { %389 = vmatpush.bf16.msra.mxu2 %v1294_v31  ;;  %402 = vmatpush.bf16.msra.mxu3 %v1298_v32  ;;  %v417_v57 = vsub.f32 1.0, %v416_v56  ;;  %v1821_v56 = vld [vmem:[#allocation10 + $0x1c4] sm:$0xf0]  ;;  %v1501_v60 = vld [vmem:[#allocation10 + $0xb0] sm:$0xf] }
  0x43   :  { %364 = vmatmul.bf16.vlgmr.msra.gmra.mxu0 %v153_v33  ;;  %v1787_v62 = vld [vmem:[#allocation10 + $0xb4] sm:$0xf0]  ;;  %v1565_v63 = vld [vmem:[#allocation10 + $0x130] sm:$0xf]  ;;  %v1801_v12 = vld [vmem:[#allocation10 + $0x124] sm:$0xf0] }
  0x44   :  { %377 = vmatmul.bf16.vlgmr.msra.gmra.mxu1 %v153_v33  ;;  %884 = vmatpush.bf16.msrb.mxu0 %v1470_v61  ;;  %v418_v29 = vmul.f32 %v1866_v55, %v417_v57  ;;  %v1438_v61 = vor.u32 %v1771_v59, %v1437_v58  ;;  %v1803_v0 = vld [vmem:[#allocation10 + $0x134] sm:$0xf0]  ;;  %v1629_v3 = vld [vmem:[#allocation10 + $0x1b0] sm:$0xf]  ;;  %v1817_v16 = vld [vmem:[#allocation10 + $0x1a4] sm:$0xf0] }
  0x45   :  { %390 = vmatmul.bf16.vlgmr.msra.gmra.mxu2 %v153_v33  ;;  %403 = vmatmul.bf16.vlgmr.msra.gmra.mxu3 %v153_v33  ;;  %v1819_v4 = vld [vmem:[#allocation10 + $0x1b4] sm:$0xf0]  ;;  %v1421_v18 = vld [vmem:[#allocation10 + $0x10] sm:$0xf]  ;;  %v1776_v58 = vld [vmem:[#allocation10 + $0x64] sm:$0xf] }
  0x46   :  { %897 = vmatpush.bf16.msrb.mxu1 %v1534_v1  ;;  %910 = vmatpush.bf16.msrb.mxu2 %v1598_v2  ;;  %v419_v31 = vadd.f32 %v1866_v55, %v418_v29  ;;  %v1502_v1 = vor.u32 %v1787_v62, %v1501_v60  ;;  %v1566_v2 = vor.u32 %v1803_v0, %v1565_v63  ;;  %v1485_v20 = vld [vmem:[#allocation10 + $0x90] sm:$0xf]  ;;  %v1783_v22 = vld [vmem:[#allocation10 + $0x94] sm:$0xf0]  ;;  %v1463_v59 = vld [vmem:[#allocation10 + $0x68] sm:$0xf0] }
  0x47   :  { %923 = vmatpush.bf16.msrb.mxu3 %v1662_v6  ;;  %v1630_v5 = vor.u32 %v1819_v4, %v1629_v3  ;;  %v1429_v6 = vld [vmem:[#allocation10 + $0x20] sm:$0xf]  ;;  %v1799_v24 = vld [vmem:[#allocation10 + $0x114] sm:$0xf0]  ;;  %v1486_v25 = vor.u32 %v1783_v22, %v1485_v20  ;;  %v1792_v62 = vld [vmem:[#allocation10 + $0xe4] sm:$0xf] }
  0x48   :  { %885 = vmatpush.bf16.msrb.mxu0 %v1462_v10  ;;  %v2189_v32 = vsel %vm420_vm0, %v1866_v55, %v419_v31  ;;  %v1637_v55 = vld [vmem:[#allocation10 + $0x1c0] sm:$0xf]  ;;  %v1430_v9 = vor.u32 %v1769_v7, %v1429_v6  ;;  %v1785_v10 = vld [vmem:[#allocation10 + $0xa4] sm:$0xf0]  ;;  %v1527_v63 = vld [vmem:[#allocation10 + $0xe8] sm:$0xf0] }
  0x49   :  { %v1638_v57 = vor.u32 %v1821_v56, %v1637_v55  ;;  %v1494_v13 = vor.u32 %v1785_v10, %v1493_v8  ;;  %v1765_v31 = vld [vmem:[#allocation10 + $0x4] sm:$0xf0]  ;;  %v1826_v55 = vld [vmem:[#allocation10 + $0x1f4] sm:$0xf]  ;;  %v1808_v0 = vld [vmem:[#allocation10 + $0x164] sm:$0xf] }
  0x4a   :  { %898 = vmatpush.bf16.msrb.mxu1 %v1526_v11  ;;  %911 = vmatpush.bf16.msrb.mxu2 %v1590_v15  ;;  %v1557_v11 = vld [vmem:[#allocation10 + $0x120] sm:$0xf]  ;;  %v1824_v3 = vld [vmem:[#allocation10 + $0x1e4] sm:$0xf]  ;;  %v1655_v4 = vld [vmem:[#allocation10 + $0x1e8] sm:$0xf0] }
  0x4b   :  { %924 = vmatpush.bf16.msrb.mxu3 %v1654_v19  ;;  %v1558_v14 = vor.u32 %v1801_v12, %v1557_v11  ;;  %v1621_v15 = vld [vmem:[#allocation10 + $0x1a0] sm:$0xf]  ;;  %v1767_v19 = vld [vmem:[#allocation10 + $0x14] sm:$0xf0]  ;;  %v1658_v6 = vor.u32 %v1824_v3, %v1655_v4  ;;  %v1774_v7 = vld [vmem:[#allocation10 + $0x54] sm:$0xf] }
  0x4c   :  { %886 = vmatpush.bf16.msrb.mxu0 %v1454_v23  ;;  %v1622_v17 = vor.u32 %v1817_v16, %v1621_v15  ;;  %v1422_v21 = vor.u32 %v1767_v19, %v1421_v18  ;;  %v1549_v23 = vld [vmem:[#allocation10 + $0x110] sm:$0xf]  ;;  %v1455_v8 = vld [vmem:[#allocation10 + $0x58] sm:$0xf0]  ;;  %v1806_v11 = vld [vmem:[#allocation10 + $0x154] sm:$0xf] }
  0x4d   :  { %v1550_v26 = vor.u32 %v1799_v24, %v1549_v23  ;;  %v1519_v10 = vld [vmem:[#allocation10 + $0xd8] sm:$0xf0]  ;;  %v1822_v15 = vld [vmem:[#allocation10 + $0x1d4] sm:$0xf]  ;;  %v1447_v19 = vld [vmem:[#allocation10 + $0x48] sm:$0xf0] }
  0x4e   :  { %899 = vmatpush.bf16.msrb.mxu1 %v1518_v27  ;;  %912 = vmatpush.bf16.msrb.mxu2 %v1582_v28  ;;  %v1613_v27 = vld [vmem:[#allocation10 + $0x190] sm:$0xf]  ;;  %v1815_v28 = vld [vmem:[#allocation10 + $0x194] sm:$0xf0]  ;;  %v1583_v12 = vld [vmem:[#allocation10 + $0x158] sm:$0xf0] }
  0x4f   :  { %925 = vmatpush.bf16.msrb.mxu3 %v1646_v30  ;;  %v1614_v29 = vor.u32 %v1815_v28, %v1613_v27  ;;  %v1413_v30 = vld [vmem:[#allocation10] sm:$0xf]  ;;  %v1647_v16 = vld [vmem:[#allocation10 + $0x1d8] sm:$0xf0]  ;;  %v1586_v18 = vor.u32 %v1806_v11, %v1583_v12  ;;  %v1788_v20 = vld [vmem:[#allocation10 + $0xc4] sm:$0xf] }
  0x50   :  { %v1650_v22 = vor.u32 %v1822_v15, %v1647_v16  ;;  %v1804_v23 = vld [vmem:[#allocation10 + $0x144] sm:$0xf]  ;;  %v1575_v24 = vld [vmem:[#allocation10 + $0x148] sm:$0xf0]  ;;  %v1551_v3 = vld [vmem:[#allocation10 + $0x118] sm:$0xf0] }
  0x51   :  { %v1814_v4 = vld [vmem:[#allocation10 + $0x194] sm:$0xf]  ;;  %v1415_v11 = vld [vmem:[#allocation10 + $0x8] sm:$0xf0]  ;;  %v1780_v12 = vld [vmem:[#allocation10 + $0x84] sm:$0xf] }
  0x52   :  { %v1796_v16 = vld [vmem:[#allocation10 + $0x104] sm:$0xf] }
  0x53   :  { %926 = vmatpush.bf16.msrb.mxu3 %v1638_v57  ;;  %v1663_v57 = vld [vmem:[#allocation10 + $0x1f8] sm:$0xf0] }
  0x54   :  { %v1666_v60 = vor.u32 %v1826_v55, %v1663_v57  ;;  %v1559_v55 = vld [vmem:[#allocation10 + $0x128] sm:$0xf0] }
  0x57   :  { %927 = vmatpush.bf16.msrb.mxu3 %v1630_v5 }
  0x5b   :  { %928 = vmatpush.bf16.msrb.mxu3 %v1622_v17  ;;  %v1772_v17 = vld [vmem:[#allocation10 + $0x44] sm:$0xf] }
  0x5c   :  { %v1450_v27 = vor.u32 %v1772_v17, %v1447_v19  ;;  %v1543_v17 = vld [vmem:[#allocation10 + $0x108] sm:$0xf0] }
  0x5d   :  { %v1607_v19 = vld [vmem:[#allocation10 + $0x188] sm:$0xf0] }
  0x5f   :  { %929 = vmatpush.bf16.msrb.mxu3 %v1614_v29  ;;  %v1578_v29 = vor.u32 %v1804_v23, %v1575_v24  ;;  %v1546_v23 = vor.u32 %v1796_v16, %v1543_v17 }
  0xc0   :  { %v365_v37 = vpop.f32.mrf.mxu0 }
  0xc1   :  { %v378_v38 = vpop.f32.mrf.mxu1  ;;  %v2177_v39 = vadd.f32 %v365_v37, %v188_v35 }
  0xc2   :  { %v2179_v40 = vadd.f32 %v378_v38, %v189_v36 }
  0xc4   :  { %v410_v43 = vadd.f32 %v2179_v40, %v2177_v39 }
  0xc8   :  { %v391_v44 = vpop.f32.mrf.mxu2  ;;  %v404_v46 = vpop.f32.mrf.mxu3 }
  0xc9   :  { %v2183_v45 = vadd.f32 %v391_v44, %v190_v41  ;;  %v367_v47 = vpop.f32.mrf.mxu0  ;;  %v2185_v48 = vadd.f32 %v404_v46, %v191_v42  ;;  %v380_v49 = vpop.f32.mrf.mxu1 }
  0xca   :  { %v1773_v47 = vld [vmem:[#allocation10 + $0x44] sm:$0xf0] }
  0xcb   :  { %v411_v50 = vadd.f32 %v410_v43, %v2183_v45 }
  0xcd   :  { %v412_v51 = vadd.f32 %v411_v50, %v2185_v48  ;;  %v1789_v50 = vld [vmem:[#allocation10 + $0xc4] sm:$0xf0] }
  0xcf   :  { %413 = vadd.xlane.f32.xlu0 %v412_v51  ;;  %v1573_v51 = vld [vmem:[#allocation10 + $0x140] sm:$0xf] }
  0xd0   :  { %v393_v52 = vpop.f32.mrf.mxu2  ;;  %v406_v53 = vpop.f32.mrf.mxu3 }
  0xd1   :  { %v1805_v52 = vld [vmem:[#allocation10 + $0x144] sm:$0xf0] }
  0xd2   :  { %v1574_v54 = vor.u32 %v1805_v52, %v1573_v51 }
  0xd4   :  { %913 = vmatpush.bf16.msrb.mxu2 %v1574_v54  ;;  %v1599_v54 = vld [vmem:[#allocation10 + $0x178] sm:$0xf0] }
  0xd8   :  { %914 = vmatpush.bf16.msrb.mxu2 %v1566_v2  ;;  %v1591_v2 = vld [vmem:[#allocation10 + $0x168] sm:$0xf0] }
  0xd9   :  { %v1594_v5 = vor.u32 %v1808_v0, %v1591_v2  ;;  %v1487_v0 = vld [vmem:[#allocation10 + $0x98] sm:$0xf0]  ;;  %v1798_v2 = vld [vmem:[#allocation10 + $0x114] sm:$0xf] }
  0xdc   :  { %915 = vmatpush.bf16.msrb.mxu2 %v1558_v14 }
  0xe0   :  { %916 = vmatpush.bf16.msrb.mxu2 %v1550_v26  ;;  %v1639_v26 = vld [vmem:[#allocation10 + $0x1c8] sm:$0xf0] }
 0x142   :  { %v414_v33 = vpop.xlane.xlu0 %413 }
 0x143   :  { %v422_v34 = vmul.f32 %v2189_v32, %v414_v33  ;;  %v1477_v33 = vld [vmem:[#allocation10 + $0x80] sm:$0xf] }
 0x145   :  { %v2193_v35 = vsub.f32 %v2177_v39, %v422_v34  ;;  %v2196_v36 = vsub.f32 %v2179_v40, %v422_v34  ;;  %v2199_v37 = vsub.f32 %v2183_v45, %v422_v34  ;;  %v2202_v38 = vsub.f32 %v2185_v48, %v422_v34  ;;  %v1445_v45 = vld [vmem:[#allocation10 + $0x40] sm:$0xf] }
 0x146   :  { %v1509_v48 = vld [vmem:[#allocation10 + $0xc0] sm:$0xf]  ;;  %v1446_v49 = vor.u32 %v1773_v47, %v1445_v45  ;;  %v1414_v34 = vor.u32 %v1765_v31, %v1413_v30  ;;  %v1778_v45 = vld [vmem:[#allocation10 + $0x74] sm:$0xf] }
 0x147   :  { %v427_v41 = vmul.f32 %v2193_v35, %v2193_v35  ;;  %v428_v42 = vmul.f32 %v2196_v36, %v2196_v36  ;;  %v429_v43 = vmul.f32 %v2199_v37, %v2199_v37  ;;  %v430_v40 = vmul.f32 %v2202_v38, %v2202_v38 }
 0x148   :  { %v1510_v53 = vor.u32 %v1789_v50, %v1509_v48  ;;  %887 = vmatpush.bf16.msrb.mxu0 %v1446_v49  ;;  %v1471_v48 = vld [vmem:[#allocation10 + $0x78] sm:$0xf0]  ;;  %v1794_v49 = vld [vmem:[#allocation10 + $0xf4] sm:$0xf] }
 0x149   :  { %v431_v39 = vadd.f32 %v428_v42, %v427_v41  ;;  %v1781_v41 = vld [vmem:[#allocation10 + $0x84] sm:$0xf0]  ;;  %v1541_v42 = vld [vmem:[#allocation10 + $0x100] sm:$0xf]  ;;  %v1535_v50 = vld [vmem:[#allocation10 + $0xf8] sm:$0xf0]  ;;  %v1474_v51 = vor.u32 %v1778_v45, %v1471_v48 }
 0x14a   :  { %900 = vmatpush.bf16.msrb.mxu1 %v1510_v53  ;;  %v1538_v52 = vor.u32 %v1794_v49, %v1535_v50  ;;  %v1810_v53 = vld [vmem:[#allocation10 + $0x174] sm:$0xf]  ;;  %v1631_v49 = vld [vmem:[#allocation10 + $0x1b8] sm:$0xf0] }
 0x14b   :  { %v432_v44 = vadd.f32 %v431_v39, %v429_v43  ;;  %v1797_v43 = vld [vmem:[#allocation10 + $0x104] sm:$0xf0]  ;;  %v1478_v39 = vor.u32 %v1781_v41, %v1477_v33  ;;  %v1602_v56 = vor.u32 %v1810_v53, %v1599_v54  ;;  %v1439_v41 = vld [vmem:[#allocation10 + $0x38] sm:$0xf0]  ;;  %v1818_v48 = vld [vmem:[#allocation10 + $0x1b4] sm:$0xf] }
 0x14c   :  { %888 = vmatpush.bf16.msrb.mxu0 %v1438_v61  ;;  %v1466_v61 = vor.u32 %v1776_v58, %v1463_v59  ;;  %v1634_v50 = vor.u32 %v1818_v48, %v1631_v49  ;;  %v1495_v53 = vld [vmem:[#allocation10 + $0xa8] sm:$0xf0]  ;;  %v1800_v54 = vld [vmem:[#allocation10 + $0x124] sm:$0xf] }
 0x14d   :  { %v433_v46 = vadd.f32 %v432_v44, %v430_v40  ;;  %v1542_v40 = vor.u32 %v1797_v43, %v1541_v42  ;;  %v1605_v44 = vld [vmem:[#allocation10 + $0x180] sm:$0xf]  ;;  %v1786_v42 = vld [vmem:[#allocation10 + $0xb4] sm:$0xf]  ;;  %v1816_v58 = vld [vmem:[#allocation10 + $0x1a4] sm:$0xf] }
 0x14e   :  { %901 = vmatpush.bf16.msrb.mxu1 %v1502_v1  ;;  %v1530_v1 = vor.u32 %v1792_v62, %v1527_v63  ;;  %v1623_v59 = vld [vmem:[#allocation10 + $0x1a8] sm:$0xf0]  ;;  %v1423_v62 = vld [vmem:[#allocation10 + $0x18] sm:$0xf0]  ;;  %v1782_v63 = vld [vmem:[#allocation10 + $0x94] sm:$0xf] }
 0x14f   :  { %434 = vadd.xlane.f32.xlu0 %v433_v46  ;;  %v1813_v46 = vld [vmem:[#allocation10 + $0x184] sm:$0xf0]  ;;  %917 = vmatpush.bf16.msrb.mxu2 %v1542_v40  ;;  %v1802_v40 = vld [vmem:[#allocation10 + $0x134] sm:$0xf] }
 0x150   :  { %889 = vmatpush.bf16.msrb.mxu0 %v1430_v9  ;;  %v1606_v47 = vor.u32 %v1813_v46, %v1605_v44  ;;  %v1790_v9 = vld [vmem:[#allocation10 + $0xd4] sm:$0xf]  ;;  %v1567_v44 = vld [vmem:[#allocation10 + $0x138] sm:$0xf0] }
 0x151   :  { %v1522_v14 = vor.u32 %v1790_v9, %v1519_v10  ;;  %v1554_v10 = vor.u32 %v1798_v2, %v1551_v3 }
 0x152   :  { %902 = vmatpush.bf16.msrb.mxu1 %v1494_v13  ;;  %930 = vmatpush.bf16.msrb.mxu3 %v1606_v47  ;;  %v1458_v13 = vor.u32 %v1774_v7, %v1455_v8  ;;  %v1570_v47 = vor.u32 %v1802_v40, %v1567_v44  ;;  %v1490_v7 = vor.u32 %v1782_v63, %v1487_v0  ;;  %v1764_v8 = vld [vmem:[#allocation10 + $0x4] sm:$0xf] }
 0x153   :  { %962 = vmatpush.bf16.msra.mxu2 %v1602_v56 }
 0x154   :  { %890 = vmatpush.bf16.msrb.mxu0 %v1422_v21  ;;  %v1511_v21 = vld [vmem:[#allocation10 + $0xc8] sm:$0xf0] }
 0x155   :  { %v1514_v28 = vor.u32 %v1788_v20, %v1511_v21  ;;  %v1418_v21 = vor.u32 %v1764_v8, %v1415_v11 }
 0x156   :  { %903 = vmatpush.bf16.msrb.mxu1 %v1486_v25  ;;  %975 = vmatpush.bf16.msra.mxu3 %v1666_v60  ;;  %v1820_v25 = vld [vmem:[#allocation10 + $0x1c4] sm:$0xf]  ;;  %v1766_v60 = vld [vmem:[#allocation10 + $0x14] sm:$0xf] }
 0x157   :  { %963 = vmatpush.bf16.msra.mxu2 %v1594_v5  ;;  %v1642_v31 = vor.u32 %v1820_v25, %v1639_v26  ;;  %v1615_v5 = vld [vmem:[#allocation10 + $0x198] sm:$0xf0]  ;;  %v408_v26 = vld [vmem:[%s2249_s3] sm:$0xf] }
 0x158   :  { %891 = vmatpush.bf16.msrb.mxu0 %v1414_v34  ;;  %v1770_v34 = vld [vmem:[#allocation10 + $0x34] sm:$0xf]  ;;  %v1618_v15 = vor.u32 %v1814_v4, %v1615_v5 }
 0x159   :  { %v1442_v43 = vor.u32 %v1770_v34, %v1439_v41  ;;  %v455_v34 = vperm.slane %v408_v26, 2  ;;  %v456_v41 = vperm.slane %v408_v26, 3  ;;  %v558_v5 = vld [vmem:[%s2252_s6] sm:$0x3] }
 0x15a   :  { %904 = vmatpush.bf16.msrb.mxu1 %v1478_v39  ;;  %976 = vmatpush.bf16.msra.mxu3 %v1658_v6  ;;  %v1503_v39 = vld [vmem:[#allocation10 + $0xb8] sm:$0xf0]  ;;  %v1426_v6 = vor.u32 %v1766_v60, %v1423_v62 }
 0x15b   :  { %964 = vmatpush.bf16.msra.mxu2 %v1586_v18  ;;  %v1506_v45 = vor.u32 %v1786_v42, %v1503_v39  ;;  %v1812_v18 = vld [vmem:[#allocation10 + $0x184] sm:$0xf] }
 0x15c   :  { %936 = vmatpush.bf16.msra.mxu0 %v1474_v51  ;;  %v1768_v51 = vld [vmem:[#allocation10 + $0x24] sm:$0xf]  ;;  %v1610_v25 = vor.u32 %v1812_v18, %v1607_v19 }
 0x15e   :  { %949 = vmatpush.bf16.msra.mxu1 %v1538_v52  ;;  %977 = vmatpush.bf16.msra.mxu3 %v1650_v22  ;;  %v1784_v52 = vld [vmem:[#allocation10 + $0xa4] sm:$0xf] }
 0x15f   :  { %965 = vmatpush.bf16.msra.mxu2 %v1578_v29  ;;  %v1498_v57 = vor.u32 %v1784_v52, %v1495_v53 }
 0x160   :  { %937 = vmatpush.bf16.msra.mxu0 %v1466_v61  ;;  %v1562_v61 = vor.u32 %v1800_v54, %v1559_v55 }
 0x162   :  { %950 = vmatpush.bf16.msra.mxu1 %v1530_v1  ;;  %978 = vmatpush.bf16.msra.mxu3 %v1642_v31  ;;  %v1626_v1 = vor.u32 %v1816_v58, %v1623_v59 }
 0x163   :  { %966 = vmatpush.bf16.msra.mxu2 %v1570_v47 }
 0x164   :  { %938 = vmatpush.bf16.msra.mxu0 %v1458_v13  ;;  %v1479_v13 = vld [vmem:[#allocation10 + $0x88] sm:$0xf0] }
 0x165   :  { %v1482_v22 = vor.u32 %v1780_v12, %v1479_v13 }
 0x166   :  { %951 = vmatpush.bf16.msra.mxu1 %v1522_v14  ;;  %979 = vmatpush.bf16.msra.mxu3 %v1634_v50 }
 0x167   :  { %967 = vmatpush.bf16.msra.mxu2 %v1562_v61 }
 0x168   :  { %939 = vmatpush.bf16.msra.mxu0 %v1450_v27 }
 0x16a   :  { %952 = vmatpush.bf16.msra.mxu1 %v1514_v28  ;;  %980 = vmatpush.bf16.msra.mxu3 %v1626_v1  ;;  %v409_v28 = vld [vmem:[#allocation8] sm:$0xf] }
 0x16b   :  { %968 = vmatpush.bf16.msra.mxu2 %v1554_v10  ;;  %v466_v31 = vperm.slane %v409_v28, 0  ;;  %v468_v39 = vperm.slane %v409_v28, 2  ;;  %v469_v40 = vperm.slane %v409_v28, 3 }
 0x16c   :  { %940 = vmatpush.bf16.msra.mxu0 %v1442_v43  ;;  %v467_v43 = vperm.slane %v409_v28, 1 }
 0x16e   :  { %953 = vmatpush.bf16.msra.mxu1 %v1506_v45  ;;  %981 = vmatpush.bf16.msra.mxu3 %v1618_v15 }
 0x16f   :  { %969 = vmatpush.bf16.msra.mxu2 %v1546_v23 }
 0x172   :  { %954 = vmatpush.bf16.msra.mxu1 %v1498_v57  ;;  %982 = vmatpush.bf16.msra.mxu3 %v1610_v25 }
 0x176   :  { %955 = vmatpush.bf16.msra.mxu1 %v1490_v7  ;;  %v561_v7 = vperm.slane %v558_v5, 1 }
 0x17a   :  { %956 = vmatpush.bf16.msra.mxu1 %v1482_v22 }
 0x1c2   :  { %v435_v30 = vpop.xlane.xlu0 %434 }
 0x1c3   :  { %v436_v33 = vmul.f32 %v435_v30, %v2189_v32  ;;  %v1431_v32 = vld [vmem:[#allocation10 + $0x28] sm:$0xf0]  ;;  %v453_v30 = vperm.slane %v408_v26, 0 }
 0x1c4   :  { %v1434_v56 = vor.u32 %v1768_v51, %v1431_v32 }
 0x1c5   :  { %v2213_v46 = vadd.f32 1e-05, %v436_v33  ;;  %v454_v33 = vperm.slane %v408_v26, 1 }
 0x1c6   :  { %941 = vmatpush.bf16.msra.mxu0 %v1434_v56 }
 0x1c7   :  { %1867 = vrsqrt.f32 %v2213_v46  ;;  %vm444_vm2 = vweird.f32 %v2213_v46 }
 0x1ca   :  { %942 = vmatpush.bf16.msra.mxu0 %v1426_v6  ;;  %v560_v6 = vperm.slane %v558_v5, 0 }
 0x1cd   :  { %v1868_v9 = vpop.eup %1867 }
 0x1ce   :  { %v439_v14 = vmul.f32 %v1868_v9, %v2213_v46  ;;  %vm445_vm1 = vweird.f32 %v1868_v9  ;;  %943 = vmatpush.bf16.msra.mxu0 %v1418_v21 }
 0x1cf   :  { %vm446_vm3 = vmor %vm444_vm2, %vm445_vm1 }
 0x1d0   :  { %v440_v20 = vmul.f32 %v1868_v9, %v439_v14 }
 0x1d2   :  { %v441_v24 = vmul.f32 0.5, %v440_v20 }
 0x1d4   :  { %v442_v27 = vsub.f32 1.5, %v441_v24 }
 0x1d6   :  { %v443_v29 = vmul.f32 %v1868_v9, %v442_v27  ;;  %v2071_v27 = vmov 256.0  }
 0x1d7   :  { %1869 = vrcp.f32 %v2071_v27 }
 0x1d8   :  { %v447_v42 = vsel %vm446_vm3, %v1868_v9, %v443_v29 }
 0x1d9   :  { %v448_v44 = vmul.f32 %v447_v42, %v2193_v35  ;;  %v449_v45 = vmul.f32 %v447_v42, %v2196_v36  ;;  %v450_v47 = vmul.f32 %v447_v42, %v2199_v37  ;;  %v451_v48 = vmul.f32 %v447_v42, %v2202_v38 }
 0x1db   :  { %v461_v46 = vmul.f32 %v453_v30, %v448_v44  ;;  %v462_v49 = vmul.f32 %v454_v33, %v449_v45  ;;  %v463_v50 = vmul.f32 %v455_v34, %v450_v47  ;;  %v464_v51 = vmul.f32 %v456_v41, %v451_v48  ;;  %v1835_v47 = vld [vmem:[#allocation13 + $0x38] sm:$0xff] }
 0x1dc   :  { %v1843_v48 = vld [vmem:[#allocation13 + $0x78] sm:$0xff] }
 0x1dd   :  { %v474_v32 = vadd.f32 %v466_v31, %v461_v46  ;;  %v475_v52 = vadd.f32 %v467_v43, %v462_v49  ;;  %v476_v53 = vadd.f32 %v468_v39, %v463_v50  ;;  %v477_v54 = vadd.f32 %v469_v40, %v464_v51  ;;  %v1870_v28 = vpop.eup %1869  ;;  %v1834_v46 = vld [vmem:[#allocation13 + $0x30] sm:$0xff]  ;;  %v1833_v50 = vld [vmem:[#allocation13 + $0x28] sm:$0xff] }
 0x1de   :  { %v994_v29 = vmul.f32 256.0, %v1870_v28  ;;  %vm998_vm8 = vweird.f32 %v1870_v28  ;;  %v1842_v49 = vld [vmem:[#allocation13 + $0x70] sm:$0xff]  ;;  %v1841_v51 = vld [vmem:[#allocation13 + $0x68] sm:$0xff] }
 0x1df   :  { %vm478_vm4 = vcmp.ge.f32.partialorder %v474_v32, 0.0  ;;  %v482_v55 = vmul.f32 0.1, %v474_v32  ;;  %vm479_vm5 = vcmp.ge.f32.partialorder %v475_v52, 0.0  ;;  %v483_v56 = vmul.f32 0.1, %v475_v52 }
 0x1e0   :  { %vm480_vm6 = vcmp.ge.f32.partialorder %v476_v53, 0.0  ;;  %v484_v35 = vmul.f32 0.1, %v476_v53  ;;  %vm481_vm7 = vcmp.ge.f32.partialorder %v477_v54, 0.0  ;;  %v485_v36 = vmul.f32 0.1, %v477_v54 }
 0x1e1   :  { %v486_v57 = vsel %vm478_vm4, %v474_v32, %v482_v55  ;;  %v487_v37 = vsel %vm479_vm5, %v475_v52, %v483_v56  ;;  %v995_v30 = vsub.f32 1.0, %v994_v29  ;;  %v1832_v32 = vld [vmem:[#allocation13 + $0x20] sm:$0xff]  ;;  %v1830_v55 = vld [vmem:[#allocation13 + $0x10] sm:$0xff]  ;;  %vm1273_vm5 = vcmask 7168  }
 0x1e2   :  { %v490_v58 = vpack.c.bf16 %v486_v57, %v486_v57  ;;  %v491_v38 = vpack.c.bf16 %v487_v37, %v487_v37  ;;  %v488_v59 = vsel %vm480_vm6, %v476_v53, %v484_v35  ;;  %v489_v60 = vsel %vm481_vm7, %v477_v54, %v485_v36  ;;  %v1840_v52 = vld [vmem:[#allocation13 + $0x60] sm:$0xff]  ;;  %v1831_v53 = vld [vmem:[#allocation13 + $0x18] sm:$0xff]  ;;  %v1838_v56 = vld [vmem:[#allocation13 + $0x50] sm:$0xff] }
 0x1e3   :  { %v492_v61 = vpack.c.bf16 %v488_v59, %v488_v59  ;;  %v493_v62 = vpack.c.bf16 %v489_v60, %v489_v60  ;;  %v996_v31 = vmul.f32 %v1870_v28, %v995_v30  ;;  %v1839_v54 = vld [vmem:[#allocation13 + $0x58] sm:$0xff]  ;;  %v1829_v35 = vld [vmem:[#allocation13 + $0x8] sm:$0xff]  ;;  %v1828_v57 = vld [vmem:[#allocation13] sm:$0xff] }
 0x1e4   :  { %892 = vmatmul.bf16.vlgmr.msrb.gmra.mxu0 %v490_v58  ;;  %905 = vmatmul.bf16.vlgmr.msrb.gmra.mxu1 %v491_v38  ;;  %v1837_v36 = vld [vmem:[#allocation13 + $0x48] sm:$0xff]  ;;  %v1836_v37 = vld [vmem:[#allocation13 + $0x40] sm:$0xff] }
 0x1e5   :  { %918 = vmatmul.bf16.vlgmr.msrb.gmra.mxu2 %v492_v61  ;;  %931 = vmatmul.bf16.vlgmr.msrb.gmra.mxu3 %v493_v62  ;;  %v997_v33 = vadd.f32 %v1870_v28, %v996_v31 }
 0x1e6   :  { %1176 = vmatpush.bf16.msrb.mxu0 %v1835_v47  ;;  %1189 = vmatpush.bf16.msrb.mxu1 %v1843_v48 }
 0x1e7   :  { %v999_v34 = vsel %vm998_vm8, %v1870_v28, %v997_v33  ;;  %v2072_v28 = vmov 128.0  }
 0x1ea   :  { %1177 = vmatpush.bf16.msrb.mxu0 %v1834_v46  ;;  %1190 = vmatpush.bf16.msrb.mxu1 %v1842_v49 }
 0x1ee   :  { %1178 = vmatpush.bf16.msrb.mxu0 %v1833_v50  ;;  %1191 = vmatpush.bf16.msrb.mxu1 %v1841_v51 }
 0x1f2   :  { %1179 = vmatpush.bf16.msrb.mxu0 %v1832_v32  ;;  %1192 = vmatpush.bf16.msrb.mxu1 %v1840_v52  ;;  %v1861_v52 = vld [vmem:[%s2257_s11] ss:$0 sm:$0xff] }
 0x1f4   :  { %944 = vmatmul.bf16.vlgmr.msra.gmra.mxu0 %v490_v58  ;;  %957 = vmatmul.bf16.vlgmr.msra.gmra.mxu1 %v491_v38 }
 0x1f5   :  { %970 = vmatmul.bf16.vlgmr.msra.gmra.mxu2 %v492_v61  ;;  %983 = vmatmul.bf16.vlgmr.msra.gmra.mxu3 %v493_v62 }
 0x1f6   :  { %1180 = vmatpush.bf16.msrb.mxu0 %v1831_v53  ;;  %1193 = vmatpush.bf16.msrb.mxu1 %v1839_v54 }
 0x1fa   :  { %1181 = vmatpush.bf16.msrb.mxu0 %v1830_v55  ;;  %1194 = vmatpush.bf16.msrb.mxu1 %v1838_v56  ;;  %v1862_v55 = vld [vmem:[%s2258_s12] ss:$0 sm:$0xff] }
 0x1fe   :  { %1182 = vmatpush.bf16.msrb.mxu0 %v1829_v35  ;;  %1195 = vmatpush.bf16.msrb.mxu1 %v1837_v36  ;;  %v1863_v36 = vld [vmem:[%s2259_s13] ss:$0 sm:$0xff] }
 0x202   :  { %1183 = vmatpush.bf16.msrb.mxu0 %v1828_v57  ;;  %1196 = vmatpush.bf16.msrb.mxu1 %v1836_v37 }
 0x261   :  { %v893_v63 = vpop.f32.mrf.mxu0  ;;  %v906_v0 = vpop.f32.mrf.mxu1 }
 0x262   :  { %v894_v10 = vadd.f32 %v893_v63, %v560_v6 }
 0x264   :  { %v907_v14 = vadd.f32 %v906_v0, %v894_v10  ;;  %v988_v0 = vld [vmem:[%s2253_s7] sm:$0x3] }
 0x265   :  { %v1024_v5 = vperm.slane %v988_v0, 1 }
 0x268   :  { %v919_v1 = vpop.f32.mrf.mxu2  ;;  %v932_v2 = vpop.f32.mrf.mxu3 }
 0x269   :  { %v895_v3 = vpop.f32.mrf.mxu0  ;;  %v908_v4 = vpop.f32.mrf.mxu1  ;;  %v920_v15 = vadd.f32 %v919_v1, %v907_v14 }
 0x26a   :  { %v989_v3 = vld [vmem:[#allocation11] sm:$0x3]  ;;  %v1023_v4 = vperm.slane %v988_v0, 0 }
 0x26b   :  { %v933_v22 = vadd.f32 %v932_v2, %v920_v15  ;;  %v1031_v10 = vperm.slane %v989_v3, 1 }
 0x270   :  { %v921_v8 = vpop.f32.mrf.mxu2  ;;  %v934_v9 = vpop.f32.mrf.mxu3 }
 0x271   :  { %v945_v11 = vpop.f32.mrf.mxu0  ;;  %v958_v12 = vpop.f32.mrf.mxu1  ;;  %v1030_v9 = vperm.slane %v989_v3, 0 }
 0x272   :  { %v946_v13 = vadd.f32 %v945_v11, %v561_v7 }
 0x274   :  { %v959_v16 = vadd.f32 %v958_v12, %v946_v13 }
 0x278   :  { %v971_v17 = vpop.f32.mrf.mxu2  ;;  %v984_v18 = vpop.f32.mrf.mxu3 }
 0x279   :  { %v972_v19 = vadd.f32 %v971_v17, %v959_v16  ;;  %v947_v20 = vpop.f32.mrf.mxu0  ;;  %v960_v21 = vpop.f32.mrf.mxu1 }
 0x27a   :  { %v1860_v21 = vld [vmem:[%s2256_s10] ss:$0 sm:$0xff] }
 0x27b   :  { %v985_v23 = vadd.f32 %v984_v18, %v972_v19 }
 0x27d   :  { %v990_v24 = vadd.f32 %v985_v23, %v933_v22 }
 0x27f   :  { %991 = vadd.xlane.f32.xlu1 %v990_v24 }
 0x280   :  { %v973_v25 = vpop.f32.mrf.mxu2  ;;  %v986_v26 = vpop.f32.mrf.mxu3 }
 0x2f2   :  { %v992_v41 = vpop.xlane.xlu1 %991 }
 0x2f3   :  { %v1000_v42 = vmul.f32 %v999_v34, %v992_v41 }
 0x2f5   :  { %v1001_v43 = vsub.f32 %v933_v22, %v1000_v42  ;;  %v1002_v39 = vsub.f32 %v985_v23, %v1000_v42 }
 0x2f7   :  { %v1003_v40 = vmul.f32 %v1001_v43, %v1001_v43  ;;  %v1004_v44 = vmul.f32 %v1002_v39, %v1002_v39 }
 0x2f9   :  { %v1005_v45 = vadd.f32 %v1004_v44, %v1003_v40 }
 0x2fb   :  { %1006 = vadd.xlane.f32.xlu1 %v1005_v45 }
 0x36e   :  { %v1007_v58 = vpop.xlane.xlu1 %1006 }
 0x36f   :  { %v1008_v38 = vmul.f32 %v1007_v58, %v999_v34 }
 0x371   :  { %v1009_v59 = vadd.f32 1e-05, %v1008_v38  ;;  %v1864_v38 = vld [vmem:[#allocation2] ss:$0 sm:$0xff] }
 0x373   :  { %1871 = vrsqrt.f32 %v1009_v59  ;;  %vm1016_vm10 = vweird.f32 %v1009_v59 }
 0x374   :  { %1873 = vrcp.f32 %v2072_v28 }
 0x379   :  { %v1872_v60 = vpop.eup %1871 }
 0x37a   :  { %v1011_v61 = vmul.f32 %v1872_v60, %v1009_v59  ;;  %vm1017_vm9 = vweird.f32 %v1872_v60  ;;  %v1874_v29 = vpop.eup %1873 }
 0x37b   :  { %vm1018_vm11 = vmor %vm1016_vm10, %vm1017_vm9  ;;  %v1207_v30 = vmul.f32 128.0, %v1874_v29  ;;  %vm1211_vm14 = vweird.f32 %v1874_v29 }
 0x37c   :  { %v1012_v62 = vmul.f32 %v1872_v60, %v1011_v61 }
 0x37d   :  { %v1208_v31 = vsub.f32 1.0, %v1207_v30 }
 0x37e   :  { %v1013_v63 = vmul.f32 0.5, %v1012_v62 }
 0x37f   :  { %v1209_v33 = vmul.f32 %v1874_v29, %v1208_v31 }
 0x380   :  { %v1014_v1 = vsub.f32 1.5, %v1013_v63 }
 0x381   :  { %v1210_v34 = vadd.f32 %v1874_v29, %v1209_v33 }
 0x382   :  { %v1015_v2 = vmul.f32 %v1872_v60, %v1014_v1 }
 0x383   :  { %v1212_v41 = vsel %vm1211_vm14, %v1874_v29, %v1210_v34 }
 0x384   :  { %v1019_v6 = vsel %vm1018_vm11, %v1872_v60, %v1015_v2 }
 0x385   :  { %v1020_v7 = vmul.f32 %v1019_v6, %v1001_v43  ;;  %v1021_v8 = vmul.f32 %v1019_v6, %v1002_v39 }
 0x387   :  { %v1027_v11 = vmul.f32 %v1023_v4, %v1020_v7  ;;  %v1028_v12 = vmul.f32 %v1024_v5, %v1021_v8 }
 0x389   :  { %v1034_v13 = vadd.f32 %v1030_v9, %v1027_v11  ;;  %v1035_v14 = vadd.f32 %v1031_v10, %v1028_v12 }
 0x38b   :  { %vm1036_vm12 = vcmp.ge.f32.partialorder %v1034_v13, 0.0  ;;  %v1038_v15 = vmul.f32 0.1, %v1034_v13  ;;  %vm1037_vm13 = vcmp.ge.f32.partialorder %v1035_v14, 0.0  ;;  %v1039_v16 = vmul.f32 0.1, %v1035_v14 }
 0x38d   :  { %v1040_v17 = vsel %vm1036_vm12, %v1034_v13, %v1038_v15  ;;  %v1041_v18 = vsel %vm1037_vm13, %v1035_v14, %v1039_v16 }
 0x38e   :  { %v1042_v19 = vpack.c.bf16 %v1040_v17, %v1040_v17  ;;  %v1043_v20 = vpack.c.bf16 %v1041_v18, %v1041_v18 }
 0x390   :  { %1184 = vmatmul.bf16.vlgmr.msrb.gmra.mxu0 %v1042_v19  ;;  %1197 = vmatmul.bf16.vlgmr.msrb.gmra.mxu1 %v1043_v20 }
 0x40d   :  { %v1185_v22 = vpop.f32.mrf.mxu0  ;;  %v1198_v23 = vpop.f32.mrf.mxu1 }
 0x40e   :  { %v1186_v24 = vadd.f32 %v1860_v21, %v1185_v22 }
 0x410   :  { %v1199_v25 = vadd.f32 %v1198_v23, %v1186_v24 }
 0x412   :  { %1204 = vadd.xlane.f32.xlu2 %v1199_v25 }
 0x415   :  { %v1187_v26 = vpop.f32.mrf.mxu0  ;;  %v1200_v27 = vpop.f32.mrf.mxu1 }
 0x485   :  { %v1205_v42 = vpop.xlane.xlu2 %1204 }
 0x486   :  { %v1213_v43 = vmul.f32 %v1212_v41, %v1205_v42 }
 0x488   :  { %v1214_v39 = vsub.f32 %v1199_v25, %v1213_v43 }
 0x48a   :  { %v1215_v40 = vmul.f32 %v1214_v39, %v1214_v39 }
 0x48c   :  { %1216 = vadd.xlane.f32.xlu2 %v1215_v40 }
 0x4ff   :  { %v1217_v44 = vpop.xlane.xlu2 %1216 }
 0x500   :  { %v1218_v45 = vmul.f32 %v1217_v44, %v1212_v41 }
 0x502   :  { %v1219_v47 = vadd.f32 1e-05, %v1218_v45 }
 0x504   :  { %1875 = vrsqrt.f32 %v1219_v47  ;;  %vm1226_vm0 = vweird.f32 %v1219_v47 }
 0x50a   :  { %v1876_v48 = vpop.eup %1875 }
 0x50b   :  { %v1221_v46 = vmul.f32 %v1876_v48, %v1219_v47  ;;  %vm1227_vm15 = vweird.f32 %v1876_v48 }
 0x50c   :  { %vm1228_vm1 = vmor %vm1226_vm0, %vm1227_vm15 }
 0x50d   :  { %v1222_v49 = vmul.f32 %v1876_v48, %v1221_v46 }
 0x50f   :  { %v1223_v50 = vmul.f32 0.5, %v1222_v49 }
 0x511   :  { %v1224_v51 = vsub.f32 1.5, %v1223_v50 }
 0x513   :  { %v1225_v32 = vmul.f32 %v1876_v48, %v1224_v51 }
 0x515   :  { %v1229_v53 = vsel %vm1228_vm1, %v1876_v48, %v1225_v32 }
 0x516   :  { %v1230_v54 = vmul.f32 %v1229_v53, %v1214_v39 }
 0x518   :  { %v1234_v56 = vmul.f32 %v1861_v52, %v1230_v54 }
 0x51a   :  { %v1238_v35 = vadd.f32 %v1862_v55, %v1234_v56 }
 0x51c   :  { %vm1239_vm2 = vcmp.ge.f32.partialorder %v1238_v35, 0.0  ;;  %v1240_v57 = vmul.f32 0.1, %v1238_v35 }
 0x51e   :  { %v1241_v37 = vsel %vm1239_vm2, %v1238_v35, %v1240_v57 }
 0x51f   :  { %v1246_v58 = vmul.f32 %v1863_v36, %v1241_v37 }
 0x521   :  { %1247 = vadd.xlane.f32.xlu0 %v1246_v58 }
 0x594   :  { %v1248_v59 = vpop.xlane.xlu0 %1247 }
 0x595   :  { %v1253_v60 = vadd.f32 %v1864_v38, %v1248_v59 }
 0x597   :  { %v1731_v61 = vmul.f32 -1.442695, %v1253_v60 }
 0x599   :  { %1877 = vpow2.f32 %v1731_v61 }
 0x59f   :  { %v1878_v62 = vpop.eup %1877 }
 0x5a0   :  { %v1257_v63 = vadd.f32 1.0, %v1878_v62 }
 0x5a2   :  { %1879 = vrcp.f32 %v1257_v63  ;;  %v1269_v3 = vand.u32 2147483648, %v1257_v63  ;;  %v1267_v5 = vand.u32 2147483647, %v1257_v63  ;;  %vm1263_vm4 = vweird.f32 %v1257_v63 }
 0x5a4   :  { %v1270_v7 = vor.u32 1.1754944e-38, %v1269_v3  ;;  %vm1268_vm7 = vcmp.eq.f32.partialorder %v1267_v5, 8.507059e+37 }
 0x5a8   :  { %v1880_v0 = vpop.eup %1879 }
 0x5a9   :  { %v1259_v1 = vmul.f32 %v1880_v0, %v1257_v63  ;;  %vm1264_vm3 = vweird.f32 %v1880_v0 }
 0x5aa   :  { %vm1265_vm6 = vmor %vm1263_vm4, %vm1264_vm3 }
 0x5ab   :  { %v1260_v2 = vsub.f32 1.0, %v1259_v1 }
 0x5ad   :  { %v1261_v4 = vmul.f32 %v1880_v0, %v1260_v2 }
 0x5af   :  { %v1262_v6 = vadd.f32 %v1880_v0, %v1261_v4 }
 0x5b1   :  { %v1266_v8 = vsel %vm1265_vm6, %v1880_v0, %v1262_v6 }
 0x5b2   :  { %v1271_v9 = vsel %vm1268_vm7, %v1270_v7, %v1266_v8 }
 0x5b3   :  { %1274 = vst.msk [vmem:[%s2261_s15] sm:$0xff] %vm1273_vm5, %v1271_v9 }
 0x5b4   :  { %1279 = vsyncpa [#allocation4], 1 }
 0x5b5   :  { %1280 = vsyncpa [#allocation6], 1 }
 0x5b6   :  { %1281 = vsyncpa [#allocation9], 1 }
 0x5b7   :  { %1282 = vsyncpa [#allocation12], 1 }

</bundles_post_ra>
